<compile_context>
chip_gen: v7x
topology: tpu7x:2x2x1
jax: 0.10.0
libtpu: 0.0.40
codegen_flags: <defaults>
</compile_context>

<pallas_src>
import jax
import jax.numpy as jnp
from jax import lax
from jax.experimental import pallas as pl
from jax.experimental.pallas import tpu as pltpu

PAD = 0


def lstm_chunk_kernel(h0_ref, c0_ref, w_hh_t_ref, gx_ref,
                      out_ref, h_out_ref, c_out_ref,
                      h_scr, c_scr):
    """One (batch-chunk, time-chunk) grid step of the LSTM recurrence.

    gx_ref:    (T_CHUNK, B_CHUNK, 4H) precomputed x-gates (= emb @ W_ih^T + b), gate
               order (i, f, o, g).
    w_hh_t_ref:(H, 4H) recurrent weight, pre-transposed, gate order (i, f, o, g).
    h_scr/c_scr: (B_CHUNK, H) VMEM carry across time chunks.
    """
    t_chunk = gx_ref.shape[0]
    H = h0_ref.shape[-1]

    # First time-chunk for this batch chunk: load the initial state into the carry.
    @pl.when(pl.program_id(1) == 0)
    def _():
        h_scr[...] = h0_ref[...]
        c_scr[...] = c0_ref[...]

    w_hh_t = w_hh_t_ref[...]                       # (H, 4H), resident for the whole chunk

    def step(t, carry):
        h, c = carry
        gates = gx_ref[t] + jnp.dot(h, w_hh_t, preferred_element_type=jnp.float32)  # (B,4H)
        # Gate order (i, f, o, g): one sigmoid over 3H lanes, one tanh over H lanes.
        sig = jax.nn.sigmoid(gates[:, :3 * H])
        g_g = jnp.tanh(gates[:, 3 * H:])
        i_g = sig[:, 0 * H:1 * H]
        f_g = sig[:, 1 * H:2 * H]
        o_g = sig[:, 2 * H:3 * H]
        c_new = f_g * c + i_g * g_g
        h_new = o_g * jnp.tanh(c_new)
        out_ref[t] = h_new                         # full-width lane-aligned store
        return (h_new, c_new)

    # Fully unrolled: t_chunk is a small static constant, lets the scheduler overlap
    # step t's store / gx load / MXU push with step t-1's sigmoid/tanh tail.
    h_n, c_n = lax.fori_loop(0, t_chunk, step, (h_scr[...], c_scr[...]), unroll=True)

    h_scr[...] = h_n
    c_scr[...] = c_n
    h_out_ref[...] = h_n                           # resident across t; written back once
    c_out_ref[...] = c_n


def _largest_divisor_leq(n, cap):
    for d in range(min(n, cap), 0, -1):
        if n % d == 0:
            return d
    return 1


def run_encoder(tokens, emb_w, h0, c0, p, *, t_chunk_cap=8, b_chunk_cap=8):
    T, B = tokens.shape
    H = h0.shape[-1]

    # Alignment guards: the gate slices at k*H and the per-step stores are only
    # free (unmasked vst, no relayout copies) under these alignments.
    assert B % 8 == 0, "batch must be a multiple of 8 (sublane alignment)"
    assert H % 128 == 0, "hidden size must be a multiple of 128 (lane alignment)"

    padding_mask = (tokens == PAD)                 # state.mask

    # ---- host-side prep (done once per parameter set) -------------------------------
    # Reorder gates from PyTorch (i, f, g, o) to (i, f, o, g) so the kernel applies a
    # single sigmoid to the first 3H columns and a single tanh to the last H columns.
    perm = jnp.concatenate([jnp.arange(0, 2 * H),          # i, f
                            jnp.arange(3 * H, 4 * H),      # o
                            jnp.arange(2 * H, 3 * H)])     # g
    w_ih = p["w_ih"][perm]                                  # (4H, E)
    w_hh_t = jnp.transpose(p["w_hh"][perm])                 # (H, 4H)
    b = (p["b_ih"] + p["b_hh"])[perm]                       # (4H,)

    # Fold the input projection into the embedding table: one (V, 4H) table, then a
    # gather replaces emb materialization + the big (T*B,E)x(E,4H) matmul.
    # emb_w[PAD] == 0, so gx_table[PAD] == b, exactly what the LSTM sees for PAD tokens.
    gx_table = (emb_w.astype(jnp.float32) @ w_ih.T + b).astype(jnp.float32)   # (V, 4H)
    gx = gx_table[tokens]                                                     # (T, B, 4H)

    # ---- grid sizing -----------------------------------------------------------------
    T_CHUNK = _largest_divisor_leq(T, t_chunk_cap)
    B_CHUNK = _largest_divisor_leq(B, b_chunk_cap)
    assert B_CHUNK % 8 == 0
    nt = T // T_CHUNK
    nb = B // B_CHUNK

    # Explicit VMEM budget from the actual footprint (double-buffered pipeline bufs).
    f32 = 4
    chunk_gx = T_CHUNK * B_CHUNK * 4 * H * f32
    chunk_out = T_CHUNK * B_CHUNK * H * f32
    whh = H * 4 * H * f32
    small = 6 * B_CHUNK * H * f32                  # h0, c0, h_out, c_out, h_scr, c_scr
    footprint = 2 * (chunk_gx + chunk_out + whh) + small
    vmem_limit = int(min(max(2 * footprint, 8 << 20), 128 << 20))

    outputs, h_n, c_n = pl.pallas_call(
        lstm_chunk_kernel,
        out_shape=(
            jax.ShapeDtypeStruct((T, B, H), jnp.float32),   # LSTM outputs, time-major
            jax.ShapeDtypeStruct((B, H), jnp.float32),      # final h
            jax.ShapeDtypeStruct((B, H), jnp.float32),      # final c
        ),
        grid_spec=pltpu.PrefetchScalarGridSpec(
            num_scalar_prefetch=0,
            grid=(nb, nt),
            in_specs=[
                pl.BlockSpec((B_CHUNK, H), lambda b, t: (b, 0)),            # h0
                pl.BlockSpec((B_CHUNK, H), lambda b, t: (b, 0)),            # c0
                pl.BlockSpec((H, 4 * H), lambda b, t: (0, 0)),              # W_hh^T (pinned)
                pl.BlockSpec((T_CHUNK, B_CHUNK, 4 * H), lambda b, t: (t, b, 0)),  # gx chunk
            ],
            out_specs=(
                pl.BlockSpec((T_CHUNK, B_CHUNK, H), lambda b, t: (t, b, 0)),  # outputs chunk
                pl.BlockSpec((B_CHUNK, H), lambda b, t: (b, 0)),              # h_n
                pl.BlockSpec((B_CHUNK, H), lambda b, t: (b, 0)),              # c_n
            ),
            scratch_shapes=[
                pltpu.VMEM((B_CHUNK, H), jnp.float32),      # h carry
                pltpu.VMEM((B_CHUNK, H), jnp.float32),      # c carry
            ],
        ),
        compiler_params=pltpu.CompilerParams(
            dimension_semantics=("parallel", "arbitrary"),
            vmem_limit_bytes=vmem_limit,
        ),
    )(h0, c0, w_hh_t, gx)

    # PyTorch nn.LSTM returns hidden as (num_layers * num_directions, B, H).
    return outputs, (h_n[None], c_n[None]), padding_mask


def reference_encoder(tokens, emb_w, h0, c0, p):
    """Pure-JAX reference (original PyTorch gate order, lax.scan over time)."""
    H = h0.shape[-1]
    emb = emb_w[tokens]
    b = p["b_ih"] + p["b_hh"]

    def step(carry, x_t):
        h, c = carry
        gates = x_t @ p["w_ih"].T + h @ p["w_hh"].T + b
        i_g = jax.nn.sigmoid(gates[:, :H])
        f_g = jax.nn.sigmoid(gates[:, H:2 * H])
        g_g = jnp.tanh(gates[:, 2 * H:3 * H])
        o_g = jax.nn.sigmoid(gates[:, 3 * H:])
        c_new = f_g * c + i_g * g_g
        h_new = o_g * jnp.tanh(c_new)
        return (h_new, c_new), h_new

    (h_n, c_n), outs = lax.scan(step, (h0, c0), emb)
    return outs, (h_n[None], c_n[None]), (tokens == PAD)


def init_params(key, V, E, H):
    ks = jax.random.split(key, 5)

    def nrm(k, shape, scale=0.1):
        return scale * jax.random.normal(k, shape, dtype=jnp.float32)

    emb_w = nrm(ks[0], (V, E)).at[PAD].set(0.0)   # nn.Embedding with padding_idx=PAD
    params = dict(
        w_ih=nrm(ks[1], (4 * H, E)),              # LSTM weight_ih_l0
        w_hh=nrm(ks[2], (4 * H, H)),              # LSTM weight_hh_l0
        b_ih=nrm(ks[3], (4 * H,)),                # LSTM bias_ih_l0
        b_hh=nrm(ks[4], (4 * H,)),                # LSTM bias_hh_l0
    )
    return emb_w, params


if __name__ == "__main__":
    key = jax.random.PRNGKey(0)
    V = 32                # vocab_size
    H = 128               # hidden_size (module default) -> lane aligned
    E = H                 # embedding_size defaults to hidden_size
    T, B = 12, 8          # seq len (time-major, batch_first=False), batch (sublane aligned)

    k_param, k_tok, k_len = jax.random.split(key, 3)
    emb_w, params = init_params(k_param, V, E, H)

    # token ids, time-major, with trailing PAD positions per batch row
    tokens = jax.random.randint(k_tok, (T, B), 1, V, dtype=jnp.int32)
    lengths = jax.random.randint(k_len, (B,), T - 4, T + 1, dtype=jnp.int32)
    tokens = jnp.where(jnp.arange(T)[:, None] < lengths[None, :], tokens, PAD)

    # hidden=None in the PyTorch forward -> zero initial LSTM state
    h0 = jnp.zeros((B, H), jnp.float32)
    c0 = jnp.zeros((B, H), jnp.float32)

    outputs, (h_n, c_n), mask = run_encoder(tokens, emb_w, h0, c0, params)
    jax.block_until_ready((outputs, h_n, c_n))

    ref_out, (ref_h, ref_c), ref_mask = reference_encoder(tokens, emb_w, h0, c0, params)
    assert outputs.shape == (T, B, H)
    assert jnp.array_equal(mask, ref_mask), "padding mask mismatch"
    assert jnp.allclose(outputs, ref_out, atol=2e-3, rtol=2e-3), "outputs mismatch"
    assert jnp.allclose(h_n, ref_h, atol=2e-3, rtol=2e-3), "hidden h mismatch"
    assert jnp.allclose(c_n, ref_c, atol=2e-3, rtol=2e-3), "cell c mismatch"
    print("KERNEL_OK")
</pallas_src>

<mosaic_0001>
module attributes {stable_mosaic.version = 11 : i64} {
  func.func @lstm_chunk_kernel(%arg0: i32, %arg1: i32, %arg2: memref<8x128xf32, #tpu.memory_space<vmem>>, %arg3: memref<8x128xf32, #tpu.memory_space<vmem>>, %arg4: memref<128x512xf32, #tpu.memory_space<vmem>>, %arg5: memref<6x8x512xf32, #tpu.memory_space<vmem>>, %arg6: memref<6x8x128xf32, #tpu.memory_space<vmem>>, %arg7: memref<8x128xf32, #tpu.memory_space<vmem>>, %arg8: memref<8x128xf32, #tpu.memory_space<vmem>>, %arg9: memref<8x128xf32, #tpu.memory_space<vmem>>, %arg10: memref<8x128xf32, #tpu.memory_space<vmem>>) attributes {dimension_semantics = [#tpu.dimension_semantics<parallel>, #tpu.dimension_semantics<arbitrary>], iteration_bounds = array<i64: 1, 2>, scalar_prefetch = 0 : i64, scratch_operands = 2 : i64, tpu.core_type = #tpu.core_type<tc>, window_params = [{transform_indices = @transform_0, window_bounds = array<i64: 8, 128>}, {transform_indices = @transform_1, window_bounds = array<i64: 8, 128>}, {pipeline_mode = #tpu.pipeline_mode<synchronous>, transform_indices = @transform_2, window_bounds = array<i64: 128, 512>}, {transform_indices = @transform_3, window_bounds = array<i64: 6, 8, 512>}, {transform_indices = @transform_4, window_bounds = array<i64: 6, 8, 128>}, {transform_indices = @transform_5, window_bounds = array<i64: 8, 128>}, {transform_indices = @transform_6, window_bounds = array<i64: 8, 128>}]} {
    %c0_i32 = arith.constant 0 : i32
    %0 = arith.cmpi eq, %arg1, %c0_i32 : i32
    %1 = arith.extui %0 : i1 to i32
    %c0_i32_0 = arith.constant 0 : i32
    %2 = arith.cmpi ne, %1, %c0_i32_0 : i32
    scf.if %2 {
      %c0_50 = arith.constant 0 : index
      %c0_51 = arith.constant 0 : index
      %160 = vector.load %arg2[%c0_50, %c0_51] : memref<8x128xf32, #tpu.memory_space<vmem>>, vector<8x128xf32>
      %c0_52 = arith.constant 0 : index
      %c0_53 = arith.constant 0 : index
      %161 = vector.load %arg9[%c0_52, %c0_53] : memref<8x128xf32, #tpu.memory_space<vmem>>, vector<8x128xf32>
      tpu.vector_store %arg9[%c0_52, %c0_53], %160 {strides = array<i32>} : memref<8x128xf32, #tpu.memory_space<vmem>>, vector<8x128xf32>,
      %c0_54 = arith.constant 0 : index
      %c0_55 = arith.constant 0 : index
      %162 = vector.load %arg3[%c0_54, %c0_55] : memref<8x128xf32, #tpu.memory_space<vmem>>, vector<8x128xf32>
      %c0_56 = arith.constant 0 : index
      %c0_57 = arith.constant 0 : index
      %163 = vector.load %arg10[%c0_56, %c0_57] : memref<8x128xf32, #tpu.memory_space<vmem>>, vector<8x128xf32>
      tpu.vector_store %arg10[%c0_56, %c0_57], %162 {strides = array<i32>} : memref<8x128xf32, #tpu.memory_space<vmem>>, vector<8x128xf32>,
    } else {
    }
    %c0 = arith.constant 0 : index
    %c0_1 = arith.constant 0 : index
    %3 = vector.load %arg4[%c0, %c0_1] : memref<128x512xf32, #tpu.memory_space<vmem>>, vector<128x512xf32>
    %c0_2 = arith.constant 0 : index
    %c0_3 = arith.constant 0 : index
    %4 = vector.load %arg9[%c0_2, %c0_3] : memref<8x128xf32, #tpu.memory_space<vmem>>, vector<8x128xf32>
    %c0_4 = arith.constant 0 : index
    %c0_5 = arith.constant 0 : index
    %5 = vector.load %arg10[%c0_4, %c0_5] : memref<8x128xf32, #tpu.memory_space<vmem>>, vector<8x128xf32>
    %c0_i32_6 = arith.constant 0 : i32
    %6 = arith.index_cast %c0_i32_6 : i32 to index
    %c0_7 = arith.constant 0 : index
    %c0_8 = arith.constant 0 : index
    %7 = vector.load %arg5[%6, %c0_7, %c0_8] : memref<6x8x512xf32, #tpu.memory_space<vmem>>, vector<1x8x512xf32>
    %8 = vector.shape_cast %7 : vector<1x8x512xf32> to vector<8x512xf32>
    %cst = arith.constant dense<0.000000e+00> : vector<8x512xf32>
    %9 = tpu.matmul %4, %3, %cst {dimension_numbers = #tpu.dot_dimension_numbers<[1], [0], [0], [1], [0, 0, 1, 1], [], []>} : vector<8x128xf32>, vector<128x512xf32>, vector<8x512xf32> -> vector<8x512xf32>
    %10 = arith.addf %8, %9 : vector<8x512xf32>
    %11 = vector.extract_strided_slice %10 {offsets = [0, 0], sizes = [8, 384], strides = [1, 1]} : vector<8x512xf32> to vector<8x384xf32>
    %12 = arith.negf %11 : vector<8x384xf32>
    %13 = math.exp %12 : vector<8x384xf32>
    %cst_9 = arith.constant 1.000000e+00 : f32
    %14 = vector.broadcast %cst_9 : f32 to vector<8x384xf32>
    %15 = arith.addf %14, %13 : vector<8x384xf32>
    %16 = arith.divf %14, %15 : vector<8x384xf32>
    %17 = vector.extract_strided_slice %10 {offsets = [0, 384], sizes = [8, 128], strides = [1, 1]} : vector<8x512xf32> to vector<8x128xf32>
    %18 = math.tanh %17 : vector<8x128xf32>
    %19 = vector.extract_strided_slice %16 {offsets = [0, 0], sizes = [8, 128], strides = [1, 1]} : vector<8x384xf32> to vector<8x128xf32>
    %20 = vector.extract_strided_slice %16 {offsets = [0, 128], sizes = [8, 128], strides = [1, 1]} : vector<8x384xf32> to vector<8x128xf32>
    %21 = vector.extract_strided_slice %16 {offsets = [0, 256], sizes = [8, 128], strides = [1, 1]} : vector<8x384xf32> to vector<8x128xf32>
    %22 = arith.mulf %20, %5 : vector<8x128xf32>
    %23 = arith.mulf %19, %18 : vector<8x128xf32>
    %24 = arith.addf %22, %23 : vector<8x128xf32>
    %25 = math.tanh %24 : vector<8x128xf32>
    %26 = arith.mulf %21, %25 : vector<8x128xf32>
    %27 = arith.index_cast %c0_i32_6 : i32 to index
    %c0_10 = arith.constant 0 : index
    %c0_11 = arith.constant 0 : index
    %28 = vector.load %arg6[%27, %c0_10, %c0_11] : memref<6x8x128xf32, #tpu.memory_space<vmem>>, vector<1x8x128xf32>
    %29 = vector.shape_cast %28 : vector<1x8x128xf32> to vector<8x128xf32>
    %30 = vector.shape_cast %26 : vector<8x128xf32> to vector<1x8x128xf32>
    tpu.vector_store %arg6[%27, %c0_10, %c0_11], %30 {strides = array<i32>} : memref<6x8x128xf32, #tpu.memory_space<vmem>>, vector<1x8x128xf32>,
    %c1_i32 = arith.constant 1 : i32
    %31 = arith.index_cast %c1_i32 : i32 to index
    %c0_12 = arith.constant 0 : index
    %c0_13 = arith.constant 0 : index
    %32 = vector.load %arg5[%31, %c0_12, %c0_13] : memref<6x8x512xf32, #tpu.memory_space<vmem>>, vector<1x8x512xf32>
    %33 = vector.shape_cast %32 : vector<1x8x512xf32> to vector<8x512xf32>
    %cst_14 = arith.constant dense<0.000000e+00> : vector<8x512xf32>
    %34 = tpu.matmul %26, %3, %cst_14 {dimension_numbers = #tpu.dot_dimension_numbers<[1], [0], [0], [1], [0, 0, 1, 1], [], []>} : vector<8x128xf32>, vector<128x512xf32>, vector<8x512xf32> -> vector<8x512xf32>
    %35 = arith.addf %33, %34 : vector<8x512xf32>
    %36 = vector.extract_strided_slice %35 {offsets = [0, 0], sizes = [8, 384], strides = [1, 1]} : vector<8x512xf32> to vector<8x384xf32>
    %37 = arith.negf %36 : vector<8x384xf32>
    %38 = math.exp %37 : vector<8x384xf32>
    %cst_15 = arith.constant 1.000000e+00 : f32
    %39 = vector.broadcast %cst_15 : f32 to vector<8x384xf32>
    %40 = arith.addf %39, %38 : vector<8x384xf32>
    %41 = arith.divf %39, %40 : vector<8x384xf32>
    %42 = vector.extract_strided_slice %35 {offsets = [0, 384], sizes = [8, 128], strides = [1, 1]} : vector<8x512xf32> to vector<8x128xf32>
    %43 = math.tanh %42 : vector<8x128xf32>
    %44 = vector.extract_strided_slice %41 {offsets = [0, 0], sizes = [8, 128], strides = [1, 1]} : vector<8x384xf32> to vector<8x128xf32>
    %45 = vector.extract_strided_slice %41 {offsets = [0, 128], sizes = [8, 128], strides = [1, 1]} : vector<8x384xf32> to vector<8x128xf32>
    %46 = vector.extract_strided_slice %41 {offsets = [0, 256], sizes = [8, 128], strides = [1, 1]} : vector<8x384xf32> to vector<8x128xf32>
    %47 = arith.mulf %45, %24 : vector<8x128xf32>
    %48 = arith.mulf %44, %43 : vector<8x128xf32>
    %49 = arith.addf %47, %48 : vector<8x128xf32>
    %50 = math.tanh %49 : vector<8x128xf32>
    %51 = arith.mulf %46, %50 : vector<8x128xf32>
    %52 = arith.index_cast %c1_i32 : i32 to index
    %c0_16 = arith.constant 0 : index
    %c0_17 = arith.constant 0 : index
    %53 = vector.load %arg6[%52, %c0_16, %c0_17] : memref<6x8x128xf32, #tpu.memory_space<vmem>>, vector<1x8x128xf32>
    %54 = vector.shape_cast %53 : vector<1x8x128xf32> to vector<8x128xf32>
    %55 = vector.shape_cast %51 : vector<8x128xf32> to vector<1x8x128xf32>
    tpu.vector_store %arg6[%52, %c0_16, %c0_17], %55 {strides = array<i32>} : memref<6x8x128xf32, #tpu.memory_space<vmem>>, vector<1x8x128xf32>,
    %c2_i32 = arith.constant 2 : i32
    %56 = arith.index_cast %c2_i32 : i32 to index
    %c0_18 = arith.constant 0 : index
    %c0_19 = arith.constant 0 : index
    %57 = vector.load %arg5[%56, %c0_18, %c0_19] : memref<6x8x512xf32, #tpu.memory_space<vmem>>, vector<1x8x512xf32>
    %58 = vector.shape_cast %57 : vector<1x8x512xf32> to vector<8x512xf32>
    %cst_20 = arith.constant dense<0.000000e+00> : vector<8x512xf32>
    %59 = tpu.matmul %51, %3, %cst_20 {dimension_numbers = #tpu.dot_dimension_numbers<[1], [0], [0], [1], [0, 0, 1, 1], [], []>} : vector<8x128xf32>, vector<128x512xf32>, vector<8x512xf32> -> vector<8x512xf32>
    %60 = arith.addf %58, %59 : vector<8x512xf32>
    %61 = vector.extract_strided_slice %60 {offsets = [0, 0], sizes = [8, 384], strides = [1, 1]} : vector<8x512xf32> to vector<8x384xf32>
    %62 = arith.negf %61 : vector<8x384xf32>
    %63 = math.exp %62 : vector<8x384xf32>
    %cst_21 = arith.constant 1.000000e+00 : f32
    %64 = vector.broadcast %cst_21 : f32 to vector<8x384xf32>
    %65 = arith.addf %64, %63 : vector<8x384xf32>
    %66 = arith.divf %64, %65 : vector<8x384xf32>
    %67 = vector.extract_strided_slice %60 {offsets = [0, 384], sizes = [8, 128], strides = [1, 1]} : vector<8x512xf32> to vector<8x128xf32>
    %68 = math.tanh %67 : vector<8x128xf32>
    %69 = vector.extract_strided_slice %66 {offsets = [0, 0], sizes = [8, 128], strides = [1, 1]} : vector<8x384xf32> to vector<8x128xf32>
    %70 = vector.extract_strided_slice %66 {offsets = [0, 128], sizes = [8, 128], strides = [1, 1]} : vector<8x384xf32> to vector<8x128xf32>
    %71 = vector.extract_strided_slice %66 {offsets = [0, 256], sizes = [8, 128], strides = [1, 1]} : vector<8x384xf32> to vector<8x128xf32>
    %72 = arith.mulf %70, %49 : vector<8x128xf32>
    %73 = arith.mulf %69, %68 : vector<8x128xf32>
    %74 = arith.addf %72, %73 : vector<8x128xf32>
    %75 = math.tanh %74 : vector<8x128xf32>
    %76 = arith.mulf %71, %75 : vector<8x128xf32>
    %77 = arith.index_cast %c2_i32 : i32 to index
    %c0_22 = arith.constant 0 : index
    %c0_23 = arith.constant 0 : index
    %78 = vector.load %arg6[%77, %c0_22, %c0_23] : memref<6x8x128xf32, #tpu.memory_space<vmem>>, vector<1x8x128xf32>
    %79 = vector.shape_cast %78 : vector<1x8x128xf32> to vector<8x128xf32>
    %80 = vector.shape_cast %76 : vector<8x128xf32> to vector<1x8x128xf32>
    tpu.vector_store %arg6[%77, %c0_22, %c0_23], %80 {strides = array<i32>} : memref<6x8x128xf32, #tpu.memory_space<vmem>>, vector<1x8x128xf32>,
    %c3_i32 = arith.constant 3 : i32
    %81 = arith.index_cast %c3_i32 : i32 to index
    %c0_24 = arith.constant 0 : index
    %c0_25 = arith.constant 0 : index
    %82 = vector.load %arg5[%81, %c0_24, %c0_25] : memref<6x8x512xf32, #tpu.memory_space<vmem>>, vector<1x8x512xf32>
    %83 = vector.shape_cast %82 : vector<1x8x512xf32> to vector<8x512xf32>
    %cst_26 = arith.constant dense<0.000000e+00> : vector<8x512xf32>
    %84 = tpu.matmul %76, %3, %cst_26 {dimension_numbers = #tpu.dot_dimension_numbers<[1], [0], [0], [1], [0, 0, 1, 1], [], []>} : vector<8x128xf32>, vector<128x512xf32>, vector<8x512xf32> -> vector<8x512xf32>
    %85 = arith.addf %83, %84 : vector<8x512xf32>
    %86 = vector.extract_strided_slice %85 {offsets = [0, 0], sizes = [8, 384], strides = [1, 1]} : vector<8x512xf32> to vector<8x384xf32>
    %87 = arith.negf %86 : vector<8x384xf32>
    %88 = math.exp %87 : vector<8x384xf32>
    %cst_27 = arith.constant 1.000000e+00 : f32
    %89 = vector.broadcast %cst_27 : f32 to vector<8x384xf32>
    %90 = arith.addf %89, %88 : vector<8x384xf32>
    %91 = arith.divf %89, %90 : vector<8x384xf32>
    %92 = vector.extract_strided_slice %85 {offsets = [0, 384], sizes = [8, 128], strides = [1, 1]} : vector<8x512xf32> to vector<8x128xf32>
    %93 = math.tanh %92 : vector<8x128xf32>
    %94 = vector.extract_strided_slice %91 {offsets = [0, 0], sizes = [8, 128], strides = [1, 1]} : vector<8x384xf32> to vector<8x128xf32>
    %95 = vector.extract_strided_slice %91 {offsets = [0, 128], sizes = [8, 128], strides = [1, 1]} : vector<8x384xf32> to vector<8x128xf32>
    %96 = vector.extract_strided_slice %91 {offsets = [0, 256], sizes = [8, 128], strides = [1, 1]} : vector<8x384xf32> to vector<8x128xf32>
    %97 = arith.mulf %95, %74 : vector<8x128xf32>
    %98 = arith.mulf %94, %93 : vector<8x128xf32>
    %99 = arith.addf %97, %98 : vector<8x128xf32>
    %100 = math.tanh %99 : vector<8x128xf32>
    %101 = arith.mulf %96, %100 : vector<8x128xf32>
    %102 = arith.index_cast %c3_i32 : i32 to index
    %c0_28 = arith.constant 0 : index
    %c0_29 = arith.constant 0 : index
    %103 = vector.load %arg6[%102, %c0_28, %c0_29] : memref<6x8x128xf32, #tpu.memory_space<vmem>>, vector<1x8x128xf32>
    %104 = vector.shape_cast %103 : vector<1x8x128xf32> to vector<8x128xf32>
    %105 = vector.shape_cast %101 : vector<8x128xf32> to vector<1x8x128xf32>
    tpu.vector_store %arg6[%102, %c0_28, %c0_29], %105 {strides = array<i32>} : memref<6x8x128xf32, #tpu.memory_space<vmem>>, vector<1x8x128xf32>,
    %c4_i32 = arith.constant 4 : i32
    %106 = arith.index_cast %c4_i32 : i32 to index
    %c0_30 = arith.constant 0 : index
    %c0_31 = arith.constant 0 : index
    %107 = vector.load %arg5[%106, %c0_30, %c0_31] : memref<6x8x512xf32, #tpu.memory_space<vmem>>, vector<1x8x512xf32>
    %108 = vector.shape_cast %107 : vector<1x8x512xf32> to vector<8x512xf32>
    %cst_32 = arith.constant dense<0.000000e+00> : vector<8x512xf32>
    %109 = tpu.matmul %101, %3, %cst_32 {dimension_numbers = #tpu.dot_dimension_numbers<[1], [0], [0], [1], [0, 0, 1, 1], [], []>} : vector<8x128xf32>, vector<128x512xf32>, vector<8x512xf32> -> vector<8x512xf32>
    %110 = arith.addf %108, %109 : vector<8x512xf32>
    %111 = vector.extract_strided_slice %110 {offsets = [0, 0], sizes = [8, 384], strides = [1, 1]} : vector<8x512xf32> to vector<8x384xf32>
    %112 = arith.negf %111 : vector<8x384xf32>
    %113 = math.exp %112 : vector<8x384xf32>
    %cst_33 = arith.constant 1.000000e+00 : f32
    %114 = vector.broadcast %cst_33 : f32 to vector<8x384xf32>
    %115 = arith.addf %114, %113 : vector<8x384xf32>
    %116 = arith.divf %114, %115 : vector<8x384xf32>
    %117 = vector.extract_strided_slice %110 {offsets = [0, 384], sizes = [8, 128], strides = [1, 1]} : vector<8x512xf32> to vector<8x128xf32>
    %118 = math.tanh %117 : vector<8x128xf32>
    %119 = vector.extract_strided_slice %116 {offsets = [0, 0], sizes = [8, 128], strides = [1, 1]} : vector<8x384xf32> to vector<8x128xf32>
    %120 = vector.extract_strided_slice %116 {offsets = [0, 128], sizes = [8, 128], strides = [1, 1]} : vector<8x384xf32> to vector<8x128xf32>
    %121 = vector.extract_strided_slice %116 {offsets = [0, 256], sizes = [8, 128], strides = [1, 1]} : vector<8x384xf32> to vector<8x128xf32>
    %122 = arith.mulf %120, %99 : vector<8x128xf32>
    %123 = arith.mulf %119, %118 : vector<8x128xf32>
    %124 = arith.addf %122, %123 : vector<8x128xf32>
    %125 = math.tanh %124 : vector<8x128xf32>
    %126 = arith.mulf %121, %125 : vector<8x128xf32>
    %127 = arith.index_cast %c4_i32 : i32 to index
    %c0_34 = arith.constant 0 : index
    %c0_35 = arith.constant 0 : index
    %128 = vector.load %arg6[%127, %c0_34, %c0_35] : memref<6x8x128xf32, #tpu.memory_space<vmem>>, vector<1x8x128xf32>
    %129 = vector.shape_cast %128 : vector<1x8x128xf32> to vector<8x128xf32>
    %130 = vector.shape_cast %126 : vector<8x128xf32> to vector<1x8x128xf32>
    tpu.vector_store %arg6[%127, %c0_34, %c0_35], %130 {strides = array<i32>} : memref<6x8x128xf32, #tpu.memory_space<vmem>>, vector<1x8x128xf32>,
    %c5_i32 = arith.constant 5 : i32
    %131 = arith.index_cast %c5_i32 : i32 to index
    %c0_36 = arith.constant 0 : index
    %c0_37 = arith.constant 0 : index
    %132 = vector.load %arg5[%131, %c0_36, %c0_37] : memref<6x8x512xf32, #tpu.memory_space<vmem>>, vector<1x8x512xf32>
    %133 = vector.shape_cast %132 : vector<1x8x512xf32> to vector<8x512xf32>
    %cst_38 = arith.constant dense<0.000000e+00> : vector<8x512xf32>
    %134 = tpu.matmul %126, %3, %cst_38 {dimension_numbers = #tpu.dot_dimension_numbers<[1], [0], [0], [1], [0, 0, 1, 1], [], []>} : vector<8x128xf32>, vector<128x512xf32>, vector<8x512xf32> -> vector<8x512xf32>
    %135 = arith.addf %133, %134 : vector<8x512xf32>
    %136 = vector.extract_strided_slice %135 {offsets = [0, 0], sizes = [8, 384], strides = [1, 1]} : vector<8x512xf32> to vector<8x384xf32>
    %137 = arith.negf %136 : vector<8x384xf32>
    %138 = math.exp %137 : vector<8x384xf32>
    %cst_39 = arith.constant 1.000000e+00 : f32
    %139 = vector.broadcast %cst_39 : f32 to vector<8x384xf32>
    %140 = arith.addf %139, %138 : vector<8x384xf32>
    %141 = arith.divf %139, %140 : vector<8x384xf32>
    %142 = vector.extract_strided_slice %135 {offsets = [0, 384], sizes = [8, 128], strides = [1, 1]} : vector<8x512xf32> to vector<8x128xf32>
    %143 = math.tanh %142 : vector<8x128xf32>
    %144 = vector.extract_strided_slice %141 {offsets = [0, 0], sizes = [8, 128], strides = [1, 1]} : vector<8x384xf32> to vector<8x128xf32>
    %145 = vector.extract_strided_slice %141 {offsets = [0, 128], sizes = [8, 128], strides = [1, 1]} : vector<8x384xf32> to vector<8x128xf32>
    %146 = vector.extract_strided_slice %141 {offsets = [0, 256], sizes = [8, 128], strides = [1, 1]} : vector<8x384xf32> to vector<8x128xf32>
    %147 = arith.mulf %145, %124 : vector<8x128xf32>
    %148 = arith.mulf %144, %143 : vector<8x128xf32>
    %149 = arith.addf %147, %148 : vector<8x128xf32>
    %150 = math.tanh %149 : vector<8x128xf32>
    %151 = arith.mulf %146, %150 : vector<8x128xf32>
    %152 = arith.index_cast %c5_i32 : i32 to index
    %c0_40 = arith.constant 0 : index
    %c0_41 = arith.constant 0 : index
    %153 = vector.load %arg6[%152, %c0_40, %c0_41] : memref<6x8x128xf32, #tpu.memory_space<vmem>>, vector<1x8x128xf32>
    %154 = vector.shape_cast %153 : vector<1x8x128xf32> to vector<8x128xf32>
    %155 = vector.shape_cast %151 : vector<8x128xf32> to vector<1x8x128xf32>
    tpu.vector_store %arg6[%152, %c0_40, %c0_41], %155 {strides = array<i32>} : memref<6x8x128xf32, #tpu.memory_space<vmem>>, vector<1x8x128xf32>,
    %c6_i32 = arith.constant 6 : i32
    %c0_42 = arith.constant 0 : index
    %c0_43 = arith.constant 0 : index
    %156 = vector.load %arg9[%c0_42, %c0_43] : memref<8x128xf32, #tpu.memory_space<vmem>>, vector<8x128xf32>
    tpu.vector_store %arg9[%c0_42, %c0_43], %151 {strides = array<i32>} : memref<8x128xf32, #tpu.memory_space<vmem>>, vector<8x128xf32>,
    %c0_44 = arith.constant 0 : index
    %c0_45 = arith.constant 0 : index
    %157 = vector.load %arg10[%c0_44, %c0_45] : memref<8x128xf32, #tpu.memory_space<vmem>>, vector<8x128xf32>
    tpu.vector_store %arg10[%c0_44, %c0_45], %149 {strides = array<i32>} : memref<8x128xf32, #tpu.memory_space<vmem>>, vector<8x128xf32>,
    %c0_46 = arith.constant 0 : index
    %c0_47 = arith.constant 0 : index
    %158 = vector.load %arg7[%c0_46, %c0_47] : memref<8x128xf32, #tpu.memory_space<vmem>>, vector<8x128xf32>
    tpu.vector_store %arg7[%c0_46, %c0_47], %151 {strides = array<i32>} : memref<8x128xf32, #tpu.memory_space<vmem>>, vector<8x128xf32>,
    %c0_48 = arith.constant 0 : index
    %c0_49 = arith.constant 0 : index
    %159 = vector.load %arg8[%c0_48, %c0_49] : memref<8x128xf32, #tpu.memory_space<vmem>>, vector<8x128xf32>
    tpu.vector_store %arg8[%c0_48, %c0_49], %149 {strides = array<i32>} : memref<8x128xf32, #tpu.memory_space<vmem>>, vector<8x128xf32>,
    return
  }
  func.func @transform_0(%arg0: i32, %arg1: i32) -> (i32, i32) {
    %c0_i32 = arith.constant 0 : i32
    %c0_i32_0 = arith.constant 0 : i32
    return %arg0, %c0_i32 : i32, i32
  }
  func.func @transform_1(%arg0: i32, %arg1: i32) -> (i32, i32) {
    %c0_i32 = arith.constant 0 : i32
    %c0_i32_0 = arith.constant 0 : i32
    return %arg0, %c0_i32 : i32, i32
  }
  func.func @transform_2(%arg0: i32, %arg1: i32) -> (i32, i32) {
    %c0_i32 = arith.constant 0 : i32
    %c0_i32_0 = arith.constant 0 : i32
    %c0_i32_1 = arith.constant 0 : i32
    return %c0_i32, %c0_i32_0 : i32, i32
  }
  func.func @transform_3(%arg0: i32, %arg1: i32) -> (i32, i32, i32) {
    %c0_i32 = arith.constant 0 : i32
    %c0_i32_0 = arith.constant 0 : i32
    return %arg1, %arg0, %c0_i32 : i32, i32, i32
  }
  func.func @transform_4(%arg0: i32, %arg1: i32) -> (i32, i32, i32) {
    %c0_i32 = arith.constant 0 : i32
    %c0_i32_0 = arith.constant 0 : i32
    return %arg1, %arg0, %c0_i32 : i32, i32, i32
  }
  func.func @transform_5(%arg0: i32, %arg1: i32) -> (i32, i32) {
    %c0_i32 = arith.constant 0 : i32
    %c0_i32_0 = arith.constant 0 : i32
    return %arg0, %c0_i32 : i32, i32
  }
  func.func @transform_6(%arg0: i32, %arg1: i32) -> (i32, i32) {
    %c0_i32 = arith.constant 0 : i32
    %c0_i32_0 = arith.constant 0 : i32
    return %arg0, %c0_i32 : i32, i32
  }
}

</mosaic_0001>

<bundles_post_ra>
// kernel: tpu_custom_call.1
= control target key start
LH: loop header
LB: loop body
LE: loop exit
PB: predicated region body
PF: predicated region fallthrough
CT: control target
= control target key end

     0   :  { %s3293_s0 = inlined_call_operand.hbm [shape: f32[8,128], index: 0, kind: input, shape index: {}]   ;;  %s3294_s1 = inlined_call_operand.hbm [shape: f32[8,128], index: 1, kind: input, shape index: {}]   ;;  %s3295_s2 = inlined_call_operand.hbm [shape: f32[128,512], index: 2, kind: input, shape index: {}]   ;;  %s3296_s3 = inlined_call_operand.hbm [shape: f32[12,8,512], index: 3, kind: input, shape index: {}]   ;;  %s3297_s4 = inlined_call_operand.hbm [shape: f32[12,8,128], index: 4, kind: output, shape index: {0}]   ;;  %s3298_s5 = inlined_call_operand.hbm [shape: f32[8,128], index: 5, kind: output, shape index: {1}]   ;;  %s3299_s6 = inlined_call_operand.hbm [shape: f32[8,128], index: 6, kind: output, shape index: {2}]  }
   0x1   :  { %3308 = sst [smem:[#allocation22_spill]] %s3293_s0 }
   0x2   :  { %3309 = sst [smem:[#allocation23_spill]] %s3294_s1 }
   0x3   :  { %12 = vsyncpa [#allocation5], 0 }
   0x4   :  { %13 = vsyncpa [#allocation8], 0 }
   0x5   :  { %14 = vsyncpa [#allocation11], 0 }
   0x6   :  { %16 = vsyncpa [#allocation11 + $0x1], 0 }
   0x7   :  { %17 = vsyncpa [#allocation6], 0 }
   0x8   :  { %19 = vsyncpa [#allocation6 + $0x1], 0 }
   0x9   :  { %20 = vsyncpa [#allocation14], 0  ;;  %s2648_s21 = smov 0   ;;  %s2650_s22 = smov 0  }
   0xa   :  { %s2652_s23 = smov 0   ;;  %s2654_s24 = smov 0  }
   0xb   :  { %s2656_s25 = smov 0   ;;  %s2658_s26 = smov 0  }
   0xc LB: > { %s1676_s27 = sadd.s32 4294967295, %s2599_s26   ;;  %s1677_s28 = sadd.s32 4294967294, %s2599_s26   ;;  %s2599_s26 = sphi %s2658_s26, %s26_s26   ;;  %s2595_s25 = sphi %s2656_s25, %s3336_s25   ;;  %s2591_s24 = sphi %s2654_s24, %s3335_s24   ;;  %s2587_s23 = sphi %s2652_s23, %s3334_s23   ;;  %s2583_s22 = sphi %s2650_s22, %s3333_s22   ;;  %s2579_s21 = sphi %s2648_s21, %s3332_s21  }
   0xd   : > { %p133_p0 = scmp.ne.s32.totalorder %s2583_s22, %s2579_s21  ;;  %p2682_p1 = scmp.eq.s32.totalorder %s1676_s27, 0 }
   0xe   : > { %p2686_p2 = scmp.eq.s32.totalorder %s1676_s27, 1  ;;  %p165_p3 = scmp.eq.s32.totalorder %s1677_s28, 1 }
   0xf   : > { %s3310_s29 = scalar_select %p2682_p1, 1, 0 }
  0x10   : > { %s3311_s30 = scalar_select %p2686_p2, 1, 0 }
  0x11   : > { %p2692_p4 = por %p2682_p1, %p133_p0  ;;  %p1678_p5 = scmp.ge.s32.totalorder %s2599_s26, 1 }
  0x12   : > { %p2697_p6 = por %p165_p3, %p133_p0  ;;  %p224_p7 = scmp.lt.s32.totalorder %s2599_s26, 3 }
  0x13   : > { %s3312_s7 = scalar_select %p2692_p4, 1, 0 }
  0x14   : > { %s3313_s8 = scalar_select %p2697_p6, 1, 0 }
  0x15   : > { %p2702_p8 = pnand %p1678_p5, %p224_p7  ;;  %s2601_s10 = smov [#allocation7]  }
  0x16   : > { %3314 = sst [smem:[#allocation21_spill]] %s3313_s8  ;;  %s252_s11 = sshll.u32 %s2601_s10, 4  ;;  %s253_s11 = int_to_ptr.vmem [resolvable:$true] %s252_s11 }
  0x17   : > { %s3315_s9 = scalar_select %p2702_p8, 1, 0 }
  0x18   : > { %p2155_p10 = pneg %p2702_p8  ;;  %s2602_s13 = smov [#allocation4]  }
  0x19   : > { %s239_s14 = sshll.u32 %s2602_s13, 4  ;;  %s2603_s15 = smov [#allocation9]   ;;  %s2715_s14 = int_to_ptr.vmem [resolvable:$true] %s239_s14 }
  0x1a   : > { %p2711_p11 = pnand %p2155_p10, %p2682_p1  ;;  %s2717_s16 = sshll.u32 %s2603_s15, 4  ;;  %s263_s16 = int_to_ptr.vmem [resolvable:$true] %s2717_s16 }
  0x1b   : > { %s3317_s1 = sld [smem:[#allocation23_spill]] }
  0x1c   : > { %p2727_p13 = pneg %p2711_p11 }
  0x21   : > { %s2339_s19 = scalar_lea.hbm %s3317_s1, 128 }
  0x22   : > { %p2340_p12 = scmp.ne.s32.totalorder %s3317_s1, %s2339_s19  ;;  %p2346_p5 = scmp.lt.u32.totalorder %s2339_s19, %s3317_s1 }
  0x24   : > { %p2342_p0 = pnand %p2727_p13, %p2340_p12 }
  0x26   : > { %p2343_p3 = pneg %p2342_p0 }
  0x28   : > { %p2348_p7 = pnand %p2346_p5, %p2343_p3 }
  0x2a   : > { %2351 = shalt.err (!%p2348_p7)
}
  0x2b   : > { %s2352_s15 = scalar_lea.vmem %s253_s11, 128  ;;  %p2360_p4 = scmp.lt.s32.totalorder %s253_s11, %s253_s11 }
  0x2c   : > { %p2353_p10 = scmp.ne.s32.totalorder %s253_s11, %s2352_s15  ;;  %p2361_p1 = scmp.lt.s32.totalorder %s2352_s15, %s2352_s15 }
  0x2e   : > { %p2355_p9 = pnand %p2353_p10, %p2727_p13  ;;  %p2362_p8 = por %p2361_p1, %p2360_p4 }
  0x30   : > { %p2356_p6 = pneg %p2355_p9 }
  0x32   : > { %p2363_p2 = pnand %p2362_p8, %p2356_p6 }
  0x34   : > { %2366 = shalt.err (!%p2363_p2)
}
  0x35   : > { %2161 = dma.hbm_to_vmem [thread:$0]  (!%p2711_p11), %s3317_s1, 128, %s253_s11, [#allocation8]  }
  0x36   : > { %s3319_s0 = sld [smem:[#allocation22_spill]] }
  0x3c   : > { %s2367_s27 = scalar_lea.hbm %s3319_s0, 128 }
  0x3d   : > { %p2368_p9 = scmp.ne.s32.totalorder %s3319_s0, %s2367_s27  ;;  %p2374_p2 = scmp.lt.u32.totalorder %s2367_s27, %s3319_s0 }
  0x3f   : > { %p2370_p12 = pnand %p2368_p9, %p2727_p13 }
  0x41   : > { %p2371_p1 = pneg %p2370_p12 }
  0x43   : > { %p2376_p4 = pnand %p2374_p2, %p2371_p1 }
  0x45   : > { %2379 = shalt.err (!%p2376_p4)
}
  0x46   : > { %s2380_s11 = scalar_lea.vmem %s2715_s14, 128  ;;  %p2388_p3 = scmp.lt.s32.totalorder %s2715_s14, %s2715_s14 }
  0x47   : > { %p2381_p6 = scmp.ne.s32.totalorder %s2715_s14, %s2380_s11  ;;  %p2389_p5 = scmp.lt.s32.totalorder %s2380_s11, %s2380_s11 }
  0x49   : > { %p2383_p8 = pnand %p2381_p6, %p2727_p13  ;;  %p2390_p7 = por %p2389_p5, %p2388_p3 }
  0x4b   : > { %p2384_p0 = pneg %p2383_p8 }
  0x4d   : > { %p2391_p10 = pnand %p2390_p7, %p2384_p0 }
  0x4f   : > { %2394 = shalt.err (!%p2391_p10)
}
  0x50   : > { %2158 = dma.hbm_to_vmem [thread:$0]  (!%p2711_p11), %s3319_s0, 128, %s2715_s14, [#allocation5]  }
  0x51   : > { %s2395_s20 = scalar_lea.hbm %s3295_s2, 8192 }
  0x52   : > { %p2396_p9 = scmp.ne.s32.totalorder %s3295_s2, %s2395_s20  ;;  %p2402_p2 = scmp.lt.u32.totalorder %s2395_s20, %s3295_s2 }
  0x54   : > { %p2398_p12 = pnand %p2396_p9, %p2727_p13 }
  0x56   : > { %p2399_p1 = pneg %p2398_p12 }
  0x58   : > { %p2404_p4 = pnand %p2402_p2, %p2399_p1 }
  0x5a   : > { %2407 = shalt.err (!%p2404_p4)
}
  0x5b   : > { %s2408_s11 = scalar_lea.vmem %s263_s16, 8192  ;;  %p2416_p3 = scmp.lt.s32.totalorder %s263_s16, %s263_s16 }
  0x5c   : > { %p2409_p6 = scmp.ne.s32.totalorder %s263_s16, %s2408_s11  ;;  %p2417_p5 = scmp.lt.s32.totalorder %s2408_s11, %s2408_s11 }
  0x5e   : > { %p2411_p8 = pnand %p2409_p6, %p2727_p13  ;;  %p2418_p7 = por %p2417_p5, %p2416_p3 }
  0x60   : > { %p2412_p0 = pneg %p2411_p8 }
  0x62   : > { %p2419_p10 = pnand %p2418_p7, %p2412_p0 }
  0x64   : > { %2422 = shalt.err (!%p2419_p10)
}
  0x65   : > { %s3306_s14 = smov 512   ;;  %s3307_s28 = smov 32  }
  0x66   : > { %2164 = dma.hbm_to_vmem [thread:$0]  (!%p2711_p11), %s3295_s2, 8192, %s263_s16, [#allocation8], %s3306_s14, %s3306_s14, %s3307_s28  }
  0x67   : > { %s120_s18 = sadd.s32 1, %s2587_s23  ;;  %s35_s19 = sadd.s32 1, %s2595_s25 }
  0x68   : > { %p127_p13 = scmp.ne.s32.totalorder %s2587_s23, %s2583_s22  ;;  %p36_p9 = scmp.ge.s32.totalorder %s35_s19, 2 }
  0x69   : > { %p128_p12 = scmp.eq.s32.totalorder %s2599_s26, 0  ;;  %p3320_p1 = scmp.ne.s32.totalorder %s3311_s30, 0 }
  0x6a   : > { %p2176_p4 = scmp.lt.s32.totalorder %s2599_s26, 2  ;;  %s3338_s19 = smov (%p36_p9, %s35_s19), 0 }
  0x6b   : > { %p2795_p2 = por %p3320_p1, %p127_p13  ;;  %p129_p6 = por %p128_p12, %p127_p13 }
  0x6c   : > { %s276_s12 = sand.u32 1, %s2587_s23   ;;  %s115_s27 = ssub.s32 %s2595_s25, %s3338_s19 }
  0x6d   : > { %p118_p8 = scmp.eq.s32.totalorder %s115_s27, 0  ;;  %s2128_s16 = smul.u32 192, %s276_s12 }
  0x6e   : > { %s1743_s10 = smul.u32 3072, %s2595_s25  ;;  %p2806_p11 = pnand %p2176_p4, %p129_p6 }
  0x6f   : > { %s2811_s15 = scalar_select %p118_p8, %s2587_s23, %s120_s18  }
  0x70   : > { %s2816_s17 = scalar_lea.hbm %s3296_s3, %s1743_s10  ;;  %s280_s27 = scalar_lea.vmem [#allocation10], %s2128_s16 }
  0x71   : > { %s290_s14 = sshll.u32 %s280_s27, 4  ;;  %s2820_s28 = scalar_lea.sflag [#allocation11], %s276_s12  ;;  %s2818_s14 = int_to_ptr.vmem [resolvable:$true] %s290_s14 }
  0x72   : > { %s2423_s0 = scalar_lea.hbm %s2816_s17, 3072  ;;  %p2425_p3 = pneg %p2806_p11 }
  0x73   : > { %p2424_p0 = scmp.ne.s32.totalorder %s2816_s17, %s2423_s0  ;;  %s2428_s11 = scalar_lea.hbm %s3296_s3, 6144 }
  0x74   : > { %p2429_p10 = scmp.lt.u32.totalorder %s2816_s17, %s3296_s3  ;;  %p2430_p13 = scmp.lt.u32.totalorder %s2428_s11, %s2423_s0 }
  0x75   : > { %p2426_p5 = pnand %p2425_p3, %p2424_p0  ;;  %p2432_p12 = scmp.lt.u32.totalorder %s2423_s0, %s2816_s17 }
  0x76   : > { %p2431_p9 = por %p2430_p13, %p2429_p10 }
  0x77   : > { %p2427_p7 = pneg %p2426_p5 }
  0x78   : > { %p2433_p1 = por %p2432_p12, %p2431_p9 }
  0x7a   : > { %p2434_p4 = pnand %p2433_p1, %p2427_p7 }
  0x7c   : > { %2437 = shalt.err (!%p2434_p4)
}
  0x7d   : > { %s2438_s12 = scalar_lea.vmem %s2818_s14, 3072  ;;  %s2606_s16 = smov [#allocation10]  }
  0x7e   : > { %p2439_p6 = scmp.ne.s32.totalorder %s2818_s14, %s2438_s12  ;;  %s2443_s27 = sshll.u32 %s2606_s16, 4  ;;  %s2444_s27 = int_to_ptr.vmem [resolvable:$false] %s2443_s27 }
  0x7f   : > { %s2445_s1 = scalar_lea.vmem %s2444_s27, 6144  ;;  %p2446_p5 = scmp.lt.s32.totalorder %s2818_s14, %s2444_s27 }
  0x80   : > { %p2441_p8 = pnand %p2439_p6, %p2425_p3  ;;  %p2447_p10 = scmp.lt.s32.totalorder %s2445_s1, %s2438_s12 }
  0x82   : > { %p2442_p0 = pneg %p2441_p8  ;;  %p2448_p13 = por %p2447_p10, %p2446_p5 }
  0x84   : > { %p2449_p9 = pnand %p2448_p13, %p2442_p0 }
  0x86   : > { %2452 = shalt.err (!%p2449_p9)
}
  0x87   : > { %s3323_s0 = smov 32   ;;  %s3324_s18 = smov 512  }
  0x88   : > { %2168 = dma.hbm_to_vmem [thread:$0]  (!%p2806_p11), %s2816_s17, 3072, %s2818_s14, %s2820_s28, %s3324_s18, %s3324_s18, %s3323_s0  }
  0x89   : > { %p3325_p3 = scmp.ne.s32.totalorder %s3315_s9, 0 }
  0x8a   : > { %p3326_p7 = scmp.ne.s32.totalorder (!%p3325_p3), %s3310_s29, 0 }
  0x8b   : > { %302 = sbr.rel (%p3325_p3) target bundleno = 1808 (0x710), region = 36 }
  0x92   : > { %2558 = dma.done.wait (%p3326_p7), [#allocation5], 128  }
  0x93   : > { %2560 = vsyncadd (%p3326_p7), [#allocation5], 4294967168 }
  0x94   : > { %2562 = dma.done.wait (%p3326_p7), [#allocation8], 8320  }
  0x95   : > { %2564 = vsyncadd (%p3326_p7), [#allocation8], 4294958976  ;;  %s2862_s13 = sand.u32 1, %s2583_s22   ;;  %p3327_p11 = scmp.ne.s32.totalorder %s3312_s7, 0 }
  0x96   : > { %s2129_s9 = smul.u32 192, %s2862_s13  ;;  %s317_s14 = scalar_lea.sflag [#allocation11], %s2862_s13 }
  0x98   : > { %s2866_s28 = scalar_lea.vmem [#allocation10], %s2129_s9 }
  0x99   : > { %2566 = dma.done.wait (%p3327_p11), %s317_s14, 3072  }
  0x9a   : > { %2568 = vsyncadd (%p3327_p11), %s317_s14, 4294964224  ;;  %s2130_s17 = smul.u32 48, %s2862_s13  ;;  %p1689_p12 = scmp.ne.s32.totalorder %s2591_s24, 0 }
  0x9b   : > { %v355_v0 = vld [vmem:[#allocation4] sm:$0xff] (!%p1689_p12)  ;;  %v357_v1 = vld [vmem:[#allocation7] sm:$0xff] (!%p1689_p12) }
  0x9c   : > { %s2873_s10 = scalar_lea.vmem [#allocation12], %s2130_s17  ;;  %354 = sbr.rel (%p1689_p12) target bundleno = 163 (0xa3), region = 56  ;;  %356 = vst [vmem:[#allocation2] sm:$0xff] (!%p1689_p12), %v355_v0  ;;  %358 = vst [vmem:[#allocation3] sm:$0xff] (!%p1689_p12), %v357_v1 }
  0xa3 PF: > { %v360_v2 = vld [vmem:[#allocation9 + $0x8] sm:$0xff]  ;;  %v359_v4 = vld [vmem:[#allocation9] sm:$0xff]  ;;  %v2607_v9 = vmov 0.0   ;;  %v362_v21 = vld [vmem:[#allocation9 + $0x18] sm:$0xff]  ;;  %s2608_s29 = smov [#allocation13]   ;;  %s1742_s11 = smul.u32 768, %s2591_s24 }
  0xa4   : > { %v364_v3 = vld [vmem:[#allocation9 + $0x28] sm:$0xff]  ;;  %v363_v6 = vld [vmem:[#allocation9 + $0x20] sm:$0xff]  ;;  %493 = vmatprep.mubr.f32.mxu0 %v2607_v9  ;;  %564 = vmatprep.mubr.f32.mxu1 %v2607_v9  ;;  %v366_v22 = vld [vmem:[#allocation9 + $0x38] sm:$0xff]  ;;  %s1520_s7 = sshll.u32 %s2608_s29, 4  ;;  %s1504_s8 = sshll.u32 %s2873_s10, 4  ;;  %s1521_s7 = int_to_ptr.vmem [resolvable:$true] %s1520_s7  ;;  %s3196_s8 = int_to_ptr.vmem [resolvable:$true] %s1504_s8 }
  0xa5   : > { %v2876_v5 = vpack.c.bf16 %v364_v3, %v360_v2  ;;  %v368_v7 = vld [vmem:[#allocation9 + $0x48] sm:$0xff]  ;;  %v2880_v10 = vpack.c.bf16 %v363_v6, %v359_v4  ;;  %v367_v12 = vld [vmem:[#allocation9 + $0x40] sm:$0xff]  ;;  %v2891_v24 = vpack.c.bf16 %v366_v22, %v362_v21  ;;  %v361_v25 = vld [vmem:[#allocation9 + $0x10] sm:$0xff]  ;;  %s2609_s12 = smov [#allocation15]   ;;  %s3194_s0 = scalar_lea.hbm %s3297_s4, %s1742_s11 }
  0xa6   : > { %v372_v8 = vld [vmem:[#allocation9 + $0x68] sm:$0xff]  ;;  %v371_v13 = vld [vmem:[#allocation9 + $0x60] sm:$0xff]  ;;  %v365_v26 = vld [vmem:[#allocation9 + $0x30] sm:$0xff]  ;;  %s1533_s16 = sshll.u32 %s2609_s12, 4  ;;  %s2453_s24 = scalar_lea.vmem %s1521_s7, 128  ;;  %s3199_s16 = int_to_ptr.vmem [resolvable:$true] %s1533_s16 }
  0xa7   : > { %v2882_v11 = vpack.c.bf16 %v372_v8, %v368_v7  ;;  %v376_v14 = vld [vmem:[#allocation9 + $0x88] sm:$0xff]  ;;  %1745 = vmatprep.subr.bf16.mxu0 %v2876_v5  ;;  %v2886_v16 = vpack.c.bf16 %v371_v13, %v367_v12  ;;  %v375_v17 = vld [vmem:[#allocation9 + $0x80] sm:$0xff]  ;;  %v2893_v27 = vpack.c.bf16 %v365_v26, %v361_v25  ;;  %1777 = vmatprep.subr.bf16.mxu1 %v2891_v24  ;;  %v370_v29 = vld [vmem:[#allocation9 + $0x58] sm:$0xff]  ;;  %p2454_p1 = scmp.ne.s32.totalorder %s1521_s7, %s2453_s24  ;;  %p3328_p4 = scmp.ne.s32.totalorder %s3311_s30, 0 }
  0xa8   : > { %v380_v15 = vld [vmem:[#allocation9 + $0xa8] sm:$0xff]  ;;  %1747 = vmatpush1.bf16.msra.mxu0 %v2880_v10  ;;  %v379_v18 = vld [vmem:[#allocation9 + $0xa0] sm:$0xff]  ;;  %v374_v30 = vld [vmem:[#allocation9 + $0x78] sm:$0xff]  ;;  %p2460_p0 = scmp.lt.s32.totalorder %s1521_s7, %s1521_s7  ;;  %p2461_p5 = scmp.lt.s32.totalorder %s2453_s24, %s2453_s24 }
  0xa9   : > { %1749 = vmatprep.subr.bf16.mxu0 %v2882_v11  ;;  %v2889_v19 = vpack.c.bf16 %v380_v15, %v376_v14  ;;  %v384_v20 = vld [vmem:[#allocation9 + $0xc8] sm:$0xff]  ;;  %v2896_v28 = vpack.c.bf16 %v379_v18, %v375_v17  ;;  %v369_v31 = vld [vmem:[#allocation9 + $0x50] sm:$0xff]  ;;  %v383_v33 = vld [vmem:[#allocation9 + $0xc0] sm:$0xff]  ;;  %1779 = vmatpush1.bf16.msra.mxu1 %v2893_v27  ;;  %v2903_v35 = vpack.c.bf16 %v374_v30, %v370_v29  ;;  %p2455_p6 = pnand %p2454_p1, %p3328_p4 }
  0xaa   : > { %v388_v23 = vld [vmem:[#allocation9 + $0xe8] sm:$0xff]  ;;  %v387_v34 = vld [vmem:[#allocation9 + $0xe0] sm:$0xff]  ;;  %v373_v36 = vld [vmem:[#allocation9 + $0x70] sm:$0xff]  ;;  %p2462_p10 = por %p2461_p5, %p2460_p0 }
  0xab   : > { %v2900_v32 = vpack.c.bf16 %v388_v23, %v384_v20  ;;  %v392_v37 = vld [vmem:[#allocation9 + $0x108] sm:$0xff]  ;;  %v2905_v39 = vpack.c.bf16 %v373_v36, %v369_v31  ;;  %v378_v40 = vld [vmem:[#allocation9 + $0x98] sm:$0xff]  ;;  %1781 = vmatprep.subr.bf16.mxu1 %v2903_v35  ;;  %v377_v42 = vld [vmem:[#allocation9 + $0x90] sm:$0xff]  ;;  %v2909_v44 = vpack.c.bf16 %v387_v34, %v383_v33  ;;  %p2456_p8 = pneg %p2455_p6 }
  0xac   : > { %1751 = vmatpush1.bf16.msra.mxu0 %v2886_v16  ;;  %v396_v38 = vld [vmem:[#allocation9 + $0x128] sm:$0xff]  ;;  %v382_v41 = vld [vmem:[#allocation9 + $0xb8] sm:$0xff]  ;;  %v381_v43 = vld [vmem:[#allocation9 + $0xb0] sm:$0xff] }
  0xad   : > { %1753 = vmatprep.subr.bf16.mxu0 %v2889_v19  ;;  %v391_v45 = vld [vmem:[#allocation9 + $0x100] sm:$0xff]  ;;  %v2911_v47 = vpack.c.bf16 %v382_v41, %v378_v40  ;;  %v2914_v48 = vpack.c.bf16 %v396_v38, %v392_v37  ;;  %1783 = vmatpush1.bf16.msra.mxu1 %v2905_v39  ;;  %v400_v49 = vld [vmem:[#allocation9 + $0x148] sm:$0xff]  ;;  %v2917_v50 = vpack.c.bf16 %v381_v43, %v377_v42  ;;  %v386_v51 = vld [vmem:[#allocation9 + $0xd8] sm:$0xff]  ;;  %p2463_p13 = pnand %p2462_p10, %p2456_p8 }
  0xae   : > { %v395_v46 = vld [vmem:[#allocation9 + $0x120] sm:$0xff]  ;;  %v390_v52 = vld [vmem:[#allocation9 + $0xf8] sm:$0xff]  ;;  %v404_v53 = vld [vmem:[#allocation9 + $0x168] sm:$0xff] }
  0xaf   : > { %1785 = vmatprep.subr.bf16.mxu1 %v2911_v47  ;;  %v2920_v54 = vpack.c.bf16 %v390_v52, %v386_v51  ;;  %v385_v55 = vld [vmem:[#allocation9 + $0xd0] sm:$0xff]  ;;  %v2923_v57 = vpack.c.bf16 %v395_v46, %v391_v45  ;;  %v394_v58 = vld [vmem:[#allocation9 + $0x118] sm:$0xff]  ;;  %v2926_v60 = vpack.c.bf16 %v404_v53, %v400_v49  ;;  %v399_v61 = vld [vmem:[#allocation9 + $0x140] sm:$0xff] }
  0xb0   : > { %1755 = vmatpush1.bf16.msra.mxu0 %v2896_v28  ;;  %v389_v56 = vld [vmem:[#allocation9 + $0xf0] sm:$0xff]  ;;  %v398_v59 = vld [vmem:[#allocation9 + $0x138] sm:$0xff]  ;;  %v403_v62 = vld [vmem:[#allocation9 + $0x160] sm:$0xff] }
  0xb1   : > { %1757 = vmatprep.subr.bf16.mxu0 %v2900_v32  ;;  %1787 = vmatpush1.bf16.msra.mxu1 %v2917_v50  ;;  %v408_v63 = vld [vmem:[#allocation9 + $0x188] sm:$0xff]  ;;  %v2929_v0 = vpack.c.bf16 %v389_v56, %v385_v55  ;;  %v2932_v2 = vpack.c.bf16 %v398_v59, %v394_v58  ;;  %v393_v3 = vld [vmem:[#allocation9 + $0x110] sm:$0xff]  ;;  %v402_v6 = vld [vmem:[#allocation9 + $0x158] sm:$0xff]  ;;  %v2935_v8 = vpack.c.bf16 %v403_v62, %v399_v61 }
  0xb2   : > { %v412_v1 = vld [vmem:[#allocation9 + $0x1a8] sm:$0xff]  ;;  %1789 = vmatprep.subr.bf16.mxu1 %v2920_v54  ;;  %v397_v4 = vld [vmem:[#allocation9 + $0x130] sm:$0xff]  ;;  %v406_v7 = vld [vmem:[#allocation9 + $0x178] sm:$0xff] }
  0xb3   : > { %v2938_v12 = vpack.c.bf16 %v412_v1, %v408_v63  ;;  %v407_v13 = vld [vmem:[#allocation9 + $0x180] sm:$0xff]  ;;  %v416_v15 = vld [vmem:[#allocation9 + $0x1c8] sm:$0xff]  ;;  %v2941_v17 = vpack.c.bf16 %v397_v4, %v393_v3  ;;  %v2944_v20 = vpack.c.bf16 %v406_v7, %v402_v6  ;;  %v401_v21 = vld [vmem:[#allocation9 + $0x150] sm:$0xff] }
  0xb4   : > { %1759 = vmatpush1.bf16.msra.mxu0 %v2909_v44  ;;  %v411_v14 = vld [vmem:[#allocation9 + $0x1a0] sm:$0xff]  ;;  %v420_v18 = vld [vmem:[#allocation9 + $0x1e8] sm:$0xff]  ;;  %v405_v22 = vld [vmem:[#allocation9 + $0x170] sm:$0xff] }
  0xb5   : > { %1761 = vmatprep.subr.bf16.mxu0 %v2914_v48  ;;  %1791 = vmatpush1.bf16.msra.mxu1 %v2929_v0  ;;  %v410_v23 = vld [vmem:[#allocation9 + $0x198] sm:$0xff]  ;;  %v2947_v26 = vpack.c.bf16 %v411_v14, %v407_v13  ;;  %v2950_v29 = vpack.c.bf16 %v420_v18, %v416_v15  ;;  %v415_v30 = vld [vmem:[#allocation9 + $0x1c0] sm:$0xff]  ;;  %v2953_v33 = vpack.c.bf16 %v405_v22, %v401_v21  ;;  %v409_v36 = vld [vmem:[#allocation9 + $0x190] sm:$0xff] }
  0xb6   : > { %1793 = vmatprep.subr.bf16.mxu1 %v2932_v2  ;;  %v414_v25 = vld [vmem:[#allocation9 + $0x1b8] sm:$0xff]  ;;  %v419_v31 = vld [vmem:[#allocation9 + $0x1e0] sm:$0xff]  ;;  %v413_v37 = vld [vmem:[#allocation9 + $0x1b0] sm:$0xff] }
  0xb7   : > { %v2956_v34 = vpack.c.bf16 %v414_v25, %v410_v23  ;;  %v418_v38 = vld [vmem:[#allocation9 + $0x1d8] sm:$0xff]  ;;  %v2959_v41 = vpack.c.bf16 %v419_v31, %v415_v30  ;;  %v2963_v42 = vpack.c.bf16 %v413_v37, %v409_v36  ;;  %v417_v45 = vld [vmem:[#allocation9 + $0x1d0] sm:$0xff]  ;;  %v423_v49 = vld [vmem:[#allocation2] sm:$0xff] }
  0xb8   : > { %1763 = vmatpush1.bf16.msra.mxu0 %v2923_v57  ;;  %v422_v40 = vld [vmem:[#allocation9 + $0x1f8] sm:$0xff]  ;;  %v421_v46 = vld [vmem:[#allocation9 + $0x1f0] sm:$0xff]  ;;  %v425_v52 = vld [vmem:[%s2866_s28] sm:$0xff] }
  0xb9   : > { %1765 = vmatprep.subr.bf16.mxu0 %v2926_v60  ;;  %1795 = vmatpush1.bf16.msra.mxu1 %v2941_v17  ;;  %v2966_v43 = vpack.c.bf16 %v422_v40, %v418_v38  ;;  %v2970_v51 = vpack.c.bf16 %v421_v46, %v417_v45  ;;  %v426_v53 = vld [vmem:[%s2866_s28 + $0x8] sm:$0xff]  ;;  %v427_v63 = vld [vmem:[%s2866_s28 + $0x10] sm:$0xff]  ;;  %v428_v6 = vld [vmem:[%s2866_s28 + $0x18] sm:$0xff] }
  0xba   : > { %1797 = vmatprep.subr.bf16.mxu1 %v2944_v20  ;;  %v424_v25 = vld [vmem:[#allocation3] sm:$0xff] }
  0xbc   : > { %1767 = vmatpush1.bf16.msra.mxu0 %v2935_v8 }
  0xbd   : > { %1769 = vmatprep.subr.bf16.mxu0 %v2938_v12  ;;  %1799 = vmatpush1.bf16.msra.mxu1 %v2953_v33 }
  0xbe   : > { %1801 = vmatprep.subr.bf16.mxu1 %v2956_v34 }
  0xc0   : > { %1771 = vmatpush1.bf16.msra.mxu0 %v2947_v26 }
  0xc1   : > { %1773 = vmatprep.subr.bf16.mxu0 %v2950_v29  ;;  %1803 = vmatpush1.bf16.msra.mxu1 %v2963_v42 }
  0xc2   : > { %1805 = vmatprep.subr.bf16.mxu1 %v2966_v43 }
  0xc4   : > { %1775 = vmatpush1.bf16.msra.mxu0 %v2959_v41 }
  0xc5   : > { %1809 = vmatprep.subr.bf16.mxu0 %v2876_v5  ;;  %1807 = vmatpush1.bf16.msra.mxu1 %v2970_v51 }
  0xc6   : > { %1841 = vmatprep.subr.bf16.mxu1 %v2891_v24 }
  0xc7   : > { %494 = vmatmul.mubr.f32.vlgmr.msra.gmra.mrb[0].mxu0 %v423_v49 }
  0xc8   : > { %1811 = vmatpush1.bf16.msra.mxu0 %v2880_v10  ;;  %669 = vmatprep.mubr.f32.mxu0 %v2607_v9 }
  0xc9   : > { %1813 = vmatprep.subr.bf16.mxu0 %v2882_v11  ;;  %565 = vmatmul.mubr.f32.vlgmr.msra.gmra.mrb[0].mxu1 %v423_v49 }
  0xca   : > { %1843 = vmatpush1.bf16.msra.mxu1 %v2893_v27  ;;  %740 = vmatprep.mubr.f32.mxu1 %v2607_v9 }
  0xcb   : > { %1845 = vmatprep.subr.bf16.mxu1 %v2903_v35 }
  0xcc   : > { %1815 = vmatpush1.bf16.msra.mxu0 %v2886_v16 }
  0xcd   : > { %1817 = vmatprep.subr.bf16.mxu0 %v2889_v19 }
  0xce   : > { %1847 = vmatpush1.bf16.msra.mxu1 %v2905_v39 }
  0xcf   : > { %1849 = vmatprep.subr.bf16.mxu1 %v2911_v47 }
  0xd0   : > { %1819 = vmatpush1.bf16.msra.mxu0 %v2896_v28 }
  0xd1   : > { %1821 = vmatprep.subr.bf16.mxu0 %v2900_v32 }
  0xd2   : > { %1851 = vmatpush1.bf16.msra.mxu1 %v2917_v50 }
  0xd3   : > { %1853 = vmatprep.subr.bf16.mxu1 %v2920_v54 }
  0xd4   : > { %1823 = vmatpush1.bf16.msra.mxu0 %v2909_v44 }
  0xd5   : > { %1825 = vmatprep.subr.bf16.mxu0 %v2914_v48 }
  0xd6   : > { %1855 = vmatpush1.bf16.msra.mxu1 %v2929_v0 }
  0xd7   : > { %1857 = vmatprep.subr.bf16.mxu1 %v2932_v2 }
  0xd8   : > { %1827 = vmatpush1.bf16.msra.mxu0 %v2923_v57 }
  0xd9   : > { %1829 = vmatprep.subr.bf16.mxu0 %v2926_v60 }
  0xda   : > { %1859 = vmatpush1.bf16.msra.mxu1 %v2941_v17 }
  0xdb   : > { %1861 = vmatprep.subr.bf16.mxu1 %v2944_v20 }
  0xdc   : > { %1831 = vmatpush1.bf16.msra.mxu0 %v2935_v8 }
  0xdd   : > { %1833 = vmatprep.subr.bf16.mxu0 %v2938_v12 }
  0xde   : > { %1863 = vmatpush1.bf16.msra.mxu1 %v2953_v33 }
  0xdf   : > { %1865 = vmatprep.subr.bf16.mxu1 %v2956_v34 }
  0xe0   : > { %1835 = vmatpush1.bf16.msra.mxu0 %v2947_v26 }
  0xe1   : > { %1837 = vmatprep.subr.bf16.mxu0 %v2950_v29 }
  0xe2   : > { %1867 = vmatpush1.bf16.msra.mxu1 %v2963_v42 }
  0xe3   : > { %1869 = vmatprep.subr.bf16.mxu1 %v2966_v43 }
  0xe4   : > { %1839 = vmatpush1.bf16.msra.mxu0 %v2959_v41 }
  0xe5   : > { %1873 = vmatprep.subr.bf16.mxu0 %v2876_v5 }
  0xe6   : > { %1871 = vmatpush1.bf16.msra.mxu1 %v2970_v51 }
  0xe7   : > { %1905 = vmatprep.subr.bf16.mxu1 %v2891_v24 }
 0x19a   : > { %v495_v55 = vpop.f32.mrb[0].mxu0 }
 0x19b   : > { %v571_v56 = vadd.f32 %v495_v55, %v425_v52  ;;  %v497_v58 = vpop.f32.mrb[1].mxu0  ;;  %v1693_v52 = vld [vmem:[%s2866_s28 + $0x20] sm:$0xff] }
 0x19c   : > { %v572_v59 = vadd.f32 %v497_v58, %v426_v53  ;;  %v566_v1 = vpop.f32.mrb[0].mxu1  ;;  %v1694_v53 = vld [vmem:[%s2866_s28 + $0x28] sm:$0xff] }
 0x19d   : > { %v1690_v61 = vmul.f32 -1.442695, %v571_v56  ;;  %v568_v3 = vpop.f32.mrb[1].mxu1  ;;  %v573_v4 = vadd.f32 %v566_v1, %v427_v63 }
 0x19e   : > { %v1691_v62 = vmul.f32 -1.442695, %v572_v59  ;;  %v574_v13 = vadd.f32 %v568_v3, %v428_v6  ;;  %v1695_v3 = vld [vmem:[%s2866_s28 + $0x30] sm:$0xff]  ;;  %v1696_v6 = vld [vmem:[%s2866_s28 + $0x38] sm:$0xff] }
 0x19f   : > { %2243 = vpow2.f32 %v1690_v61  ;;  %v1692_v7 = vmul.f32 -1.442695, %v573_v4 }
 0x1a0   : > { %2245 = vpow2.f32 %v1691_v62 }
 0x1a1   : > { %2247 = vpow2.f32 %v1692_v7 }
 0x1a2   : > { %2249 = vtanh.f32 %v574_v13 }
 0x1a9   : > { %v2244_v14 = vpop.eup %2243 }
 0x1aa   : > { %v2246_v15 = vpop.eup %2245  ;;  %v584_v18 = vadd.f32 1.0, %v2244_v14 }
 0x1ab   : > { %v585_v21 = vadd.f32 1.0, %v2246_v15  ;;  %v2248_v22 = vpop.eup %2247 }
 0x1ac   : > { %2251 = vrcp.f32 %v584_v18  ;;  %v2250_v23 = vpop.eup %2249  ;;  %v586_v31 = vadd.f32 1.0, %v2248_v22 }
 0x1ad   : > { %2253 = vrcp.f32 %v585_v21 }
 0x1ae   : > { %2255 = vrcp.f32 %v586_v31 }
 0x1b6   : > { %v2252_v30 = vpop.eup %2251 }
 0x1b7   : > { %v2254_v36 = vpop.eup %2253  ;;  %v595_v37 = vmul.f32 %v2252_v30, %v2250_v23 }
 0x1b8   : > { %v594_v38 = vmul.f32 %v2254_v36, %v424_v25  ;;  %v2256_v45 = vpop.eup %2255 }
 0x1ba   : > { %v3014_v40 = vadd.f32 %v595_v37, %v594_v38 }
 0x1bc   : > { %2257 = vtanh.f32 %v3014_v40 }
 0x1c6   : > { %v2258_v46 = vpop.eup %2257 }
 0x1c7   : > { %v598_v49 = vmul.f32 %v2258_v46, %v2256_v45 }
 0x1c9   : > { %599 = vst [vmem:[%s2873_s10] sm:$0xff] %v598_v49  ;;  %670 = vmatmul.mubr.f32.vlgmr.msra.gmra.mrb[2].mxu0 %v598_v49  ;;  %741 = vmatmul.mubr.f32.vlgmr.msra.gmra.mrb[2].mxu1 %v598_v49 }
 0x1ca   : > { %1875 = vmatpush1.bf16.msra.mxu0 %v2880_v10  ;;  %1907 = vmatpush1.bf16.msra.mxu1 %v2893_v27 }
 0x1cb   : > { %1877 = vmatprep.subr.bf16.mxu0 %v2882_v11  ;;  %1909 = vmatprep.subr.bf16.mxu1 %v2903_v35 }
 0x1cc   : > { %846 = vmatprep.mubr.f32.mxu0 %v2607_v9  ;;  %917 = vmatprep.mubr.f32.mxu1 %v2607_v9 }
 0x1ce   : > { %1879 = vmatpush1.bf16.msra.mxu0 %v2886_v16  ;;  %1911 = vmatpush1.bf16.msra.mxu1 %v2905_v39 }
 0x1cf   : > { %1881 = vmatprep.subr.bf16.mxu0 %v2889_v19  ;;  %1913 = vmatprep.subr.bf16.mxu1 %v2911_v47 }
 0x1d2   : > { %1883 = vmatpush1.bf16.msra.mxu0 %v2896_v28  ;;  %1915 = vmatpush1.bf16.msra.mxu1 %v2917_v50 }
 0x1d3   : > { %1885 = vmatprep.subr.bf16.mxu0 %v2900_v32  ;;  %1917 = vmatprep.subr.bf16.mxu1 %v2920_v54 }
 0x1d6   : > { %1887 = vmatpush1.bf16.msra.mxu0 %v2909_v44  ;;  %1919 = vmatpush1.bf16.msra.mxu1 %v2929_v0 }
 0x1d7   : > { %1889 = vmatprep.subr.bf16.mxu0 %v2914_v48  ;;  %1921 = vmatprep.subr.bf16.mxu1 %v2932_v2 }
 0x1da   : > { %1891 = vmatpush1.bf16.msra.mxu0 %v2923_v57  ;;  %1923 = vmatpush1.bf16.msra.mxu1 %v2941_v17 }
 0x1db   : > { %1893 = vmatprep.subr.bf16.mxu0 %v2926_v60  ;;  %1925 = vmatprep.subr.bf16.mxu1 %v2944_v20 }
 0x1de   : > { %1895 = vmatpush1.bf16.msra.mxu0 %v2935_v8  ;;  %1927 = vmatpush1.bf16.msra.mxu1 %v2953_v33 }
 0x1df   : > { %1897 = vmatprep.subr.bf16.mxu0 %v2938_v12  ;;  %1929 = vmatprep.subr.bf16.mxu1 %v2956_v34 }
 0x1e2   : > { %1899 = vmatpush1.bf16.msra.mxu0 %v2947_v26  ;;  %1931 = vmatpush1.bf16.msra.mxu1 %v2963_v42 }
 0x1e3   : > { %1901 = vmatprep.subr.bf16.mxu0 %v2950_v29  ;;  %1933 = vmatprep.subr.bf16.mxu1 %v2966_v43 }
 0x1e6   : > { %1903 = vmatpush1.bf16.msra.mxu0 %v2959_v41  ;;  %1935 = vmatpush1.bf16.msra.mxu1 %v2970_v51 }
 0x1e7   : > { %1937 = vmatprep.subr.bf16.mxu0 %v2876_v5  ;;  %1969 = vmatprep.subr.bf16.mxu1 %v2891_v24 }
 0x29c   : > { %v671_v55 = vpop.f32.mrb[2].mxu0  ;;  %v742_v56 = vpop.f32.mrb[2].mxu1 }
 0x29d   : > { %v747_v58 = vadd.f32 %v1693_v52, %v671_v55  ;;  %v673_v59 = vpop.f32.mrb[3].mxu0  ;;  %v744_v61 = vpop.f32.mrb[3].mxu1  ;;  %v749_v4 = vadd.f32 %v1695_v3, %v742_v56  ;;  %v1702_v52 = vld [vmem:[%s2866_s28 + $0x48] sm:$0xff] }
 0x29e   : > { %v748_v62 = vadd.f32 %v1694_v53, %v673_v59  ;;  %v750_v7 = vadd.f32 %v1696_v6, %v744_v61 }
 0x29f   : > { %v1697_v63 = vmul.f32 -1.442695, %v747_v58  ;;  %v1699_v13 = vmul.f32 -1.442695, %v749_v4  ;;  %v1704_v4 = vld [vmem:[%s2866_s28 + $0x58] sm:$0xff] }
 0x2a0   : > { %v1698_v1 = vmul.f32 -1.442695, %v748_v62 }
 0x2a1   : > { %2259 = vpow2.f32 %v1697_v63 }
 0x2a2   : > { %2261 = vpow2.f32 %v1698_v1  ;;  %v1703_v1 = vld [vmem:[%s2866_s28 + $0x50] sm:$0xff] }
 0x2a3   : > { %2263 = vtanh.f32 %v750_v7 }
 0x2a4   : > { %2265 = vpow2.f32 %v1699_v13 }
 0x2ab   : > { %v2260_v14 = vpop.eup %2259 }
 0x2ac   : > { %v760_v15 = vadd.f32 1.0, %v2260_v14  ;;  %v2262_v18 = vpop.eup %2261 }
 0x2ad   : > { %v761_v21 = vadd.f32 1.0, %v2262_v18  ;;  %v2264_v22 = vpop.eup %2263 }
 0x2ae   : > { %2267 = vrcp.f32 %v760_v15  ;;  %v2266_v23 = vpop.eup %2265 }
 0x2af   : > { %2269 = vrcp.f32 %v761_v21  ;;  %v762_v36 = vadd.f32 1.0, %v2266_v23 }
 0x2b1   : > { %2271 = vrcp.f32 %v762_v36 }
 0x2b8   : > { %v2268_v25 = vpop.eup %2267 }
 0x2b9   : > { %v771_v30 = vmul.f32 %v2268_v25, %v2264_v22  ;;  %v2270_v31 = vpop.eup %2269 }
 0x2ba   : > { %v770_v37 = vmul.f32 %v2270_v31, %v3014_v40  ;;  %v1701_v40 = vld [vmem:[%s2866_s28 + $0x40] sm:$0xff] }
 0x2bb   : > { %v2272_v45 = vpop.eup %2271 }
 0x2bc   : > { %v3057_v38 = vadd.f32 %v771_v30, %v770_v37 }
 0x2be   : > { %2273 = vtanh.f32 %v3057_v38 }
 0x2c8   : > { %v2274_v46 = vpop.eup %2273 }
 0x2c9   : > { %v774_v49 = vmul.f32 %v2274_v46, %v2272_v45 }
 0x2cb   : > { %1700 = vst [vmem:[%s2873_s10 + $0x8] sm:$0xff] %v774_v49  ;;  %847 = vmatmul.mubr.f32.vlgmr.msra.gmra.mrb[4].mxu0 %v774_v49  ;;  %918 = vmatmul.mubr.f32.vlgmr.msra.gmra.mrb[4].mxu1 %v774_v49 }
 0x2cc   : > { %1939 = vmatpush1.bf16.msra.mxu0 %v2880_v10  ;;  %1971 = vmatpush1.bf16.msra.mxu1 %v2893_v27 }
 0x2cd   : > { %1941 = vmatprep.subr.bf16.mxu0 %v2882_v11  ;;  %1973 = vmatprep.subr.bf16.mxu1 %v2903_v35 }
 0x2ce   : > { %1023 = vmatprep.mubr.f32.mxu0 %v2607_v9  ;;  %1094 = vmatprep.mubr.f32.mxu1 %v2607_v9 }
 0x2d0   : > { %1943 = vmatpush1.bf16.msra.mxu0 %v2886_v16  ;;  %1975 = vmatpush1.bf16.msra.mxu1 %v2905_v39 }
 0x2d1   : > { %1945 = vmatprep.subr.bf16.mxu0 %v2889_v19  ;;  %1977 = vmatprep.subr.bf16.mxu1 %v2911_v47 }
 0x2d4   : > { %1947 = vmatpush1.bf16.msra.mxu0 %v2896_v28  ;;  %1979 = vmatpush1.bf16.msra.mxu1 %v2917_v50 }
 0x2d5   : > { %1949 = vmatprep.subr.bf16.mxu0 %v2900_v32  ;;  %1981 = vmatprep.subr.bf16.mxu1 %v2920_v54 }
 0x2d8   : > { %1951 = vmatpush1.bf16.msra.mxu0 %v2909_v44  ;;  %1983 = vmatpush1.bf16.msra.mxu1 %v2929_v0 }
 0x2d9   : > { %1953 = vmatprep.subr.bf16.mxu0 %v2914_v48  ;;  %1985 = vmatprep.subr.bf16.mxu1 %v2932_v2 }
 0x2dc   : > { %1955 = vmatpush1.bf16.msra.mxu0 %v2923_v57  ;;  %1987 = vmatpush1.bf16.msra.mxu1 %v2941_v17 }
 0x2dd   : > { %1957 = vmatprep.subr.bf16.mxu0 %v2926_v60  ;;  %1989 = vmatprep.subr.bf16.mxu1 %v2944_v20 }
 0x2e0   : > { %1959 = vmatpush1.bf16.msra.mxu0 %v2935_v8  ;;  %1991 = vmatpush1.bf16.msra.mxu1 %v2953_v33 }
 0x2e1   : > { %1961 = vmatprep.subr.bf16.mxu0 %v2938_v12  ;;  %1993 = vmatprep.subr.bf16.mxu1 %v2956_v34 }
 0x2e4   : > { %1963 = vmatpush1.bf16.msra.mxu0 %v2947_v26  ;;  %1995 = vmatpush1.bf16.msra.mxu1 %v2963_v42 }
 0x2e5   : > { %1965 = vmatprep.subr.bf16.mxu0 %v2950_v29  ;;  %1997 = vmatprep.subr.bf16.mxu1 %v2966_v43 }
 0x2e8   : > { %1967 = vmatpush1.bf16.msra.mxu0 %v2959_v41  ;;  %1999 = vmatpush1.bf16.msra.mxu1 %v2970_v51 }
 0x2e9   : > { %2001 = vmatprep.subr.bf16.mxu0 %v2876_v5  ;;  %2033 = vmatprep.subr.bf16.mxu1 %v2891_v24 }
 0x39e   : > { %v848_v53 = vpop.f32.mrb[4].mxu0  ;;  %v919_v55 = vpop.f32.mrb[4].mxu1 }
 0x39f   : > { %v924_v56 = vadd.f32 %v1701_v40, %v848_v53  ;;  %v850_v58 = vpop.f32.mrb[5].mxu0  ;;  %v921_v59 = vpop.f32.mrb[5].mxu1  ;;  %v926_v3 = vadd.f32 %v1703_v1, %v919_v55  ;;  %v1710_v40 = vld [vmem:[%s2866_s28 + $0x68] sm:$0xff] }
 0x3a0   : > { %v925_v61 = vadd.f32 %v1702_v52, %v850_v58  ;;  %v927_v6 = vadd.f32 %v1704_v4, %v921_v59 }
 0x3a1   : > { %v1705_v62 = vmul.f32 -1.442695, %v924_v56  ;;  %v1707_v7 = vmul.f32 -1.442695, %v926_v3  ;;  %v1712_v3 = vld [vmem:[%s2866_s28 + $0x78] sm:$0xff] }
 0x3a2   : > { %v1706_v63 = vmul.f32 -1.442695, %v925_v61 }
 0x3a3   : > { %2275 = vpow2.f32 %v1705_v62 }
 0x3a4   : > { %2277 = vpow2.f32 %v1706_v63  ;;  %v1711_v63 = vld [vmem:[%s2866_s28 + $0x70] sm:$0xff] }
 0x3a5   : > { %2279 = vtanh.f32 %v927_v6 }
 0x3a6   : > { %2281 = vpow2.f32 %v1707_v7 }
 0x3ad   : > { %v2276_v13 = vpop.eup %2275 }
 0x3ae   : > { %v937_v14 = vadd.f32 1.0, %v2276_v13  ;;  %v2278_v15 = vpop.eup %2277 }
 0x3af   : > { %v938_v18 = vadd.f32 1.0, %v2278_v15  ;;  %v2280_v21 = vpop.eup %2279 }
 0x3b0   : > { %2283 = vrcp.f32 %v937_v14  ;;  %v2282_v22 = vpop.eup %2281 }
 0x3b1   : > { %2285 = vrcp.f32 %v938_v18  ;;  %v939_v31 = vadd.f32 1.0, %v2282_v22 }
 0x3b3   : > { %2287 = vrcp.f32 %v939_v31 }
 0x3ba   : > { %v2284_v23 = vpop.eup %2283 }
 0x3bb   : > { %v948_v25 = vmul.f32 %v2284_v23, %v2280_v21  ;;  %v2286_v30 = vpop.eup %2285 }
 0x3bc   : > { %v947_v36 = vmul.f32 %v2286_v30, %v3057_v38  ;;  %v1709_v38 = vld [vmem:[%s2866_s28 + $0x60] sm:$0xff] }
 0x3bd   : > { %v2288_v45 = vpop.eup %2287 }
 0x3be   : > { %v3100_v37 = vadd.f32 %v948_v25, %v947_v36 }
 0x3c0   : > { %2289 = vtanh.f32 %v3100_v37 }
 0x3ca   : > { %v2290_v46 = vpop.eup %2289 }
 0x3cb   : > { %v951_v49 = vmul.f32 %v2290_v46, %v2288_v45 }
 0x3cd   : > { %1708 = vst [vmem:[%s2873_s10 + $0x10] sm:$0xff] %v951_v49  ;;  %1024 = vmatmul.mubr.f32.vlgmr.msra.gmra.mrb[6].mxu0 %v951_v49  ;;  %1095 = vmatmul.mubr.f32.vlgmr.msra.gmra.mrb[6].mxu1 %v951_v49 }
 0x3ce   : > { %2003 = vmatpush1.bf16.msra.mxu0 %v2880_v10  ;;  %2035 = vmatpush1.bf16.msra.mxu1 %v2893_v27 }
 0x3cf   : > { %2005 = vmatprep.subr.bf16.mxu0 %v2882_v11  ;;  %2037 = vmatprep.subr.bf16.mxu1 %v2903_v35 }
 0x3d0   : > { %1200 = vmatprep.mubr.f32.mxu0 %v2607_v9  ;;  %1271 = vmatprep.mubr.f32.mxu1 %v2607_v9 }
 0x3d2   : > { %2007 = vmatpush1.bf16.msra.mxu0 %v2886_v16  ;;  %2039 = vmatpush1.bf16.msra.mxu1 %v2905_v39 }
 0x3d3   : > { %2009 = vmatprep.subr.bf16.mxu0 %v2889_v19  ;;  %2041 = vmatprep.subr.bf16.mxu1 %v2911_v47 }
 0x3d6   : > { %2011 = vmatpush1.bf16.msra.mxu0 %v2896_v28  ;;  %2043 = vmatpush1.bf16.msra.mxu1 %v2917_v50 }
 0x3d7   : > { %2013 = vmatprep.subr.bf16.mxu0 %v2900_v32  ;;  %2045 = vmatprep.subr.bf16.mxu1 %v2920_v54 }
 0x3da   : > { %2015 = vmatpush1.bf16.msra.mxu0 %v2909_v44  ;;  %2047 = vmatpush1.bf16.msra.mxu1 %v2929_v0 }
 0x3db   : > { %2017 = vmatprep.subr.bf16.mxu0 %v2914_v48  ;;  %2049 = vmatprep.subr.bf16.mxu1 %v2932_v2 }
 0x3de   : > { %2019 = vmatpush1.bf16.msra.mxu0 %v2923_v57  ;;  %2051 = vmatpush1.bf16.msra.mxu1 %v2941_v17 }
 0x3df   : > { %2021 = vmatprep.subr.bf16.mxu0 %v2926_v60  ;;  %2053 = vmatprep.subr.bf16.mxu1 %v2944_v20 }
 0x3e2   : > { %2023 = vmatpush1.bf16.msra.mxu0 %v2935_v8  ;;  %2055 = vmatpush1.bf16.msra.mxu1 %v2953_v33 }
 0x3e3   : > { %2025 = vmatprep.subr.bf16.mxu0 %v2938_v12  ;;  %2057 = vmatprep.subr.bf16.mxu1 %v2956_v34 }
 0x3e6   : > { %2027 = vmatpush1.bf16.msra.mxu0 %v2947_v26  ;;  %2059 = vmatpush1.bf16.msra.mxu1 %v2963_v42 }
 0x3e7   : > { %2029 = vmatprep.subr.bf16.mxu0 %v2950_v29  ;;  %2061 = vmatprep.subr.bf16.mxu1 %v2966_v43 }
 0x3ea   : > { %2031 = vmatpush1.bf16.msra.mxu0 %v2959_v41  ;;  %2063 = vmatpush1.bf16.msra.mxu1 %v2970_v51 }
 0x3eb   : > { %2065 = vmatprep.subr.bf16.mxu0 %v2876_v5  ;;  %2097 = vmatprep.subr.bf16.mxu1 %v2891_v24 }
 0x4a0   : > { %v1025_v52 = vpop.f32.mrb[6].mxu0  ;;  %v1096_v53 = vpop.f32.mrb[6].mxu1 }
 0x4a1   : > { %v1101_v55 = vadd.f32 %v1709_v38, %v1025_v52  ;;  %v1027_v56 = vpop.f32.mrb[7].mxu0  ;;  %v1098_v58 = vpop.f32.mrb[7].mxu1  ;;  %v1103_v1 = vadd.f32 %v1711_v63, %v1096_v53 }
 0x4a2   : > { %v1102_v59 = vadd.f32 %v1710_v40, %v1027_v56  ;;  %v1104_v4 = vadd.f32 %v1712_v3, %v1098_v58  ;;  %v1727_v58 = vld [vmem:[%s2866_s28 + $0xb0] sm:$0xff] }
 0x4a3   : > { %v1713_v61 = vmul.f32 -1.442695, %v1101_v55  ;;  %v1715_v5 = vmul.f32 -1.442695, %v1103_v1 }
 0x4a4   : > { %v1714_v62 = vmul.f32 -1.442695, %v1102_v59 }
 0x4a5   : > { %2291 = vpow2.f32 %v1713_v61  ;;  %v1728_v61 = vld [vmem:[%s2866_s28 + $0xb8] sm:$0xff] }
 0x4a6   : > { %2293 = vpow2.f32 %v1714_v62 }
 0x4a7   : > { %2295 = vtanh.f32 %v1104_v4 }
 0x4a8   : > { %2297 = vpow2.f32 %v1715_v5 }
 0x4af   : > { %v2292_v6 = vpop.eup %2291 }
 0x4b0   : > { %v1114_v7 = vadd.f32 1.0, %v2292_v6  ;;  %v2294_v24 = vpop.eup %2293 }
 0x4b1   : > { %v1115_v13 = vadd.f32 1.0, %v2294_v24  ;;  %v2296_v14 = vpop.eup %2295 }
 0x4b2   : > { %2299 = vrcp.f32 %v1114_v7  ;;  %v2298_v15 = vpop.eup %2297 }
 0x4b3   : > { %2301 = vrcp.f32 %v1115_v13  ;;  %v1116_v23 = vadd.f32 1.0, %v2298_v15 }
 0x4b5   : > { %2303 = vrcp.f32 %v1116_v23 }
 0x4bc   : > { %v2300_v18 = vpop.eup %2299 }
 0x4bd   : > { %v1125_v21 = vmul.f32 %v2300_v18, %v2296_v14  ;;  %v2302_v22 = vpop.eup %2301 }
 0x4be   : > { %v1124_v25 = vmul.f32 %v2302_v22, %v3100_v37  ;;  %v1726_v37 = vld [vmem:[%s2866_s28 + $0xa8] sm:$0xff] }
 0x4bf   : > { %v2304_v31 = vpop.eup %2303 }
 0x4c0   : > { %v3143_v30 = vadd.f32 %v1125_v21, %v1124_v25 }
 0x4c2   : > { %2305 = vtanh.f32 %v3143_v30 }
 0x4cc   : > { %v2306_v36 = vpop.eup %2305 }
 0x4cd   : > { %v1128_v45 = vmul.f32 %v2306_v36, %v2304_v31 }
 0x4cf   : > { %1716 = vst [vmem:[%s2873_s10 + $0x18] sm:$0xff] %v1128_v45  ;;  %1201 = vmatmul.mubr.f32.vlgmr.msra.gmra.mrb[8].mxu0 %v1128_v45  ;;  %1272 = vmatmul.mubr.f32.vlgmr.msra.gmra.mrb[8].mxu1 %v1128_v45 }
 0x4d0   : > { %2067 = vmatpush1.bf16.msra.mxu0 %v2880_v10  ;;  %2099 = vmatpush1.bf16.msra.mxu1 %v2893_v27  ;;  %v1718_v10 = vld [vmem:[%s2866_s28 + $0x88] sm:$0xff] }
 0x4d1   : > { %2069 = vmatprep.subr.bf16.mxu0 %v2882_v11  ;;  %2101 = vmatprep.subr.bf16.mxu1 %v2903_v35 }
 0x4d2   : > { %1377 = vmatprep.mubr.f32.mxu0 %v2607_v9  ;;  %1448 = vmatprep.mubr.f32.mxu1 %v2607_v9  ;;  %v1717_v9 = vld [vmem:[%s2866_s28 + $0x80] sm:$0xff] }
 0x4d4   : > { %2071 = vmatpush1.bf16.msra.mxu0 %v2886_v16  ;;  %2103 = vmatpush1.bf16.msra.mxu1 %v2905_v39 }
 0x4d5   : > { %2073 = vmatprep.subr.bf16.mxu0 %v2889_v19  ;;  %2105 = vmatprep.subr.bf16.mxu1 %v2911_v47 }
 0x4d8   : > { %2075 = vmatpush1.bf16.msra.mxu0 %v2896_v28  ;;  %2107 = vmatpush1.bf16.msra.mxu1 %v2917_v50 }
 0x4d9   : > { %2077 = vmatprep.subr.bf16.mxu0 %v2900_v32  ;;  %2109 = vmatprep.subr.bf16.mxu1 %v2920_v54 }
 0x4dc   : > { %2079 = vmatpush1.bf16.msra.mxu0 %v2909_v44  ;;  %2111 = vmatpush1.bf16.msra.mxu1 %v2929_v0  ;;  %v1719_v44 = vld [vmem:[%s2866_s28 + $0x90] sm:$0xff] }
 0x4dd   : > { %2081 = vmatprep.subr.bf16.mxu0 %v2914_v48  ;;  %2113 = vmatprep.subr.bf16.mxu1 %v2932_v2  ;;  %v1720_v48 = vld [vmem:[%s2866_s28 + $0x98] sm:$0xff] }
 0x4e0   : > { %2083 = vmatpush1.bf16.msra.mxu0 %v2923_v57  ;;  %2115 = vmatpush1.bf16.msra.mxu1 %v2941_v17 }
 0x4e1   : > { %2085 = vmatprep.subr.bf16.mxu0 %v2926_v60  ;;  %2117 = vmatprep.subr.bf16.mxu1 %v2944_v20 }
 0x4e4   : > { %2087 = vmatpush1.bf16.msra.mxu0 %v2935_v8  ;;  %2119 = vmatpush1.bf16.msra.mxu1 %v2953_v33 }
 0x4e5   : > { %2089 = vmatprep.subr.bf16.mxu0 %v2938_v12  ;;  %2121 = vmatprep.subr.bf16.mxu1 %v2956_v34 }
 0x4e8   : > { %2091 = vmatpush1.bf16.msra.mxu0 %v2947_v26  ;;  %2123 = vmatpush1.bf16.msra.mxu1 %v2963_v42 }
 0x4e9   : > { %2093 = vmatprep.subr.bf16.mxu0 %v2950_v29  ;;  %2125 = vmatprep.subr.bf16.mxu1 %v2966_v43 }
 0x4ec   : > { %2095 = vmatpush1.bf16.msra.mxu0 %v2959_v41  ;;  %2127 = vmatpush1.bf16.msra.mxu1 %v2970_v51  ;;  %v1725_v51 = vld [vmem:[%s2866_s28 + $0xa0] sm:$0xff] }
 0x5a2   : > { %v1202_v11 = vpop.f32.mrb[8].mxu0  ;;  %v1273_v16 = vpop.f32.mrb[8].mxu1 }
 0x5a3   : > { %v1278_v19 = vadd.f32 %v1717_v9, %v1202_v11  ;;  %v1204_v27 = vpop.f32.mrb[9].mxu0  ;;  %v1275_v28 = vpop.f32.mrb[9].mxu1  ;;  %v1280_v47 = vadd.f32 %v1719_v44, %v1273_v16 }
 0x5a4   : > { %v1279_v32 = vadd.f32 %v1718_v10, %v1204_v27  ;;  %v1281_v50 = vadd.f32 %v1720_v48, %v1275_v28 }
 0x5a5   : > { %v1721_v35 = vmul.f32 -1.442695, %v1278_v19  ;;  %v1723_v54 = vmul.f32 -1.442695, %v1280_v47 }
 0x5a6   : > { %v1722_v39 = vmul.f32 -1.442695, %v1279_v32 }
 0x5a7   : > { %2307 = vpow2.f32 %v1721_v35 }
 0x5a8   : > { %2309 = vpow2.f32 %v1722_v39 }
 0x5a9   : > { %2311 = vtanh.f32 %v1281_v50 }
 0x5aa   : > { %2313 = vpow2.f32 %v1723_v54 }
 0x5b1   : > { %v2308_v57 = vpop.eup %2307 }
 0x5b2   : > { %v1291_v60 = vadd.f32 1.0, %v2308_v57  ;;  %v2310_v0 = vpop.eup %2309 }
 0x5b3   : > { %v1292_v2 = vadd.f32 1.0, %v2310_v0  ;;  %v2312_v8 = vpop.eup %2311 }
 0x5b4   : > { %2315 = vrcp.f32 %v1291_v60  ;;  %v2314_v12 = vpop.eup %2313 }
 0x5b5   : > { %2317 = vrcp.f32 %v1292_v2  ;;  %v1293_v29 = vadd.f32 1.0, %v2314_v12 }
 0x5b7   : > { %2319 = vrcp.f32 %v1293_v29 }
 0x5be   : > { %v2316_v17 = vpop.eup %2315 }
 0x5bf   : > { %v1302_v20 = vmul.f32 %v2316_v17, %v2312_v8  ;;  %v2318_v26 = vpop.eup %2317 }
 0x5c0   : > { %v1301_v33 = vmul.f32 %v2318_v26, %v3143_v30 }
 0x5c1   : > { %v2320_v41 = vpop.eup %2319 }
 0x5c2   : > { %v1303_v34 = vadd.f32 %v1302_v20, %v1301_v33 }
 0x5c4   : > { %2321 = vtanh.f32 %v1303_v34 }
 0x5ce   : > { %v2322_v42 = vpop.eup %2321 }
 0x5cf   : > { %v1305_v43 = vmul.f32 %v2322_v42, %v2320_v41 }
 0x5d1   : > { %1724 = vst [vmem:[%s2873_s10 + $0x20] sm:$0xff] %v1305_v43  ;;  %1378 = vmatmul.mubr.f32.vlgmr.msra.gmra.mrb[10].mxu0 %v1305_v43  ;;  %1449 = vmatmul.mubr.f32.vlgmr.msra.gmra.mrb[10].mxu1 %v1305_v43 }
 0x6a4   : > { %v1379_v46 = vpop.f32.mrb[10].mxu0  ;;  %v1450_v49 = vpop.f32.mrb[10].mxu1 }
 0x6a5   : > { %v1455_v38 = vadd.f32 %v1725_v51, %v1379_v46  ;;  %v1381_v40 = vpop.f32.mrb[11].mxu0  ;;  %v1452_v52 = vpop.f32.mrb[11].mxu1  ;;  %v1457_v59 = vadd.f32 %v1727_v58, %v1450_v49 }
 0x6a6   : > { %v1456_v53 = vadd.f32 %v1726_v37, %v1381_v40  ;;  %v1458_v62 = vadd.f32 %v1728_v61, %v1452_v52 }
 0x6a7   : > { %v1729_v55 = vmul.f32 -1.442695, %v1455_v38  ;;  %v1731_v63 = vmul.f32 -1.442695, %v1457_v59 }
 0x6a8   : > { %v1730_v56 = vmul.f32 -1.442695, %v1456_v53 }
 0x6a9   : > { %2323 = vpow2.f32 %v1729_v55 }
 0x6aa   : > { %2325 = vpow2.f32 %v1730_v56 }
 0x6ab   : > { %2327 = vtanh.f32 %v1458_v62 }
 0x6ac   : > { %2329 = vpow2.f32 %v1731_v63 }
 0x6b3   : > { %v2324_v1 = vpop.eup %2323 }
 0x6b4   : > { %v1468_v3 = vadd.f32 1.0, %v2324_v1  ;;  %v2326_v4 = vpop.eup %2325 }
 0x6b5   : > { %v1469_v5 = vadd.f32 1.0, %v2326_v4  ;;  %v2328_v6 = vpop.eup %2327 }
 0x6b6   : > { %2331 = vrcp.f32 %v1468_v3  ;;  %v2330_v7 = vpop.eup %2329 }
 0x6b7   : > { %2333 = vrcp.f32 %v1469_v5  ;;  %v1470_v15 = vadd.f32 1.0, %v2330_v7 }
 0x6b9   : > { %2335 = vrcp.f32 %v1470_v15 }
 0x6c0   : > { %v2332_v24 = vpop.eup %2331 }
 0x6c1   : > { %v1479_v13 = vmul.f32 %v2332_v24, %v2328_v6  ;;  %v2334_v14 = vpop.eup %2333 }
 0x6c2   : > { %v1478_v18 = vmul.f32 %v2334_v14, %v1303_v34 }
 0x6c3   : > { %v2336_v22 = vpop.eup %2335 }
 0x6c4   : > { %v1480_v21 = vadd.f32 %v1479_v13, %v1478_v18 }
 0x6c6   : > { %1486 = vst [vmem:[#allocation3] sm:$0xff] %v1480_v21  ;;  %1488 = vst [vmem:[#allocation15] sm:$0xff] %v1480_v21  ;;  %2337 = vtanh.f32 %v1480_v21 }
 0x6d0   : > { %v2338_v23 = vpop.eup %2337 }
 0x6d1   : > { %v1482_v25 = vmul.f32 %v2338_v23, %v2336_v22 }
 0x6d3   : > { %1732 = vst [vmem:[%s2873_s10 + $0x28] sm:$0xff] %v1482_v25  ;;  %1485 = vst [vmem:[#allocation2] sm:$0xff] %v1482_v25 }
 0x6d4   : > { %1487 = vst [vmem:[#allocation13] sm:$0xff] %v1482_v25 }
 0x6d5   : > { %2466 = shalt.err (!%p2463_p13)
}
 0x6d6   : > { %s2467_s14 = scalar_lea.hbm %s3298_s5, 128 }
 0x6d7   : > { %p2468_p9 = scmp.ne.s32.totalorder %s3298_s5, %s2467_s14  ;;  %p2473_p11 = scmp.lt.u32.totalorder %s2467_s14, %s3298_s5 }
 0x6d9   : > { %p2469_p3 = pnand %p2468_p9, %p3328_p4 }
 0x6db   : > { %p2470_p7 = pneg %p2469_p3 }
 0x6dd   : > { %p2475_p12 = pnand %p2473_p11, %p2470_p7 }
 0x6df   : > { %2478 = shalt.err (!%p2475_p12)
}
 0x6e0   : > { %2147 = dma.vmem_to_hbm [thread:$0]  (%p3328_p4), %s1521_s7, 128, %s3298_s5, [#allocation14]  }
 0x6e1   : > { %s1490_s27 = scalar_lea.sflag [#allocation6], %s2862_s13  ;;  %s2479_s1 = scalar_lea.vmem %s3196_s8, 768 }
 0x6e2   : > { %p2480_p1 = scmp.ne.s32.totalorder %s3196_s8, %s2479_s1  ;;  %s2610_s24 = smov [#allocation12]  }
 0x6e3   : > { %s2483_s18 = sshll.u32 %s2610_s24, 4  ;;  %s2484_s18 = int_to_ptr.vmem [resolvable:$false] %s2483_s18 }
 0x6e4   : > { %p2481_p6 = pnand %p2480_p1, %p2795_p2  ;;  %s2485_s9 = scalar_lea.vmem %s2484_s18, 1536 }
 0x6e5   : > { %p2486_p0 = scmp.lt.s32.totalorder %s3196_s8, %s2484_s18  ;;  %p2487_p5 = scmp.lt.s32.totalorder %s2485_s9, %s2479_s1 }
 0x6e6   : > { %p2482_p8 = pneg %p2481_p6 }
 0x6e7   : > { %p2488_p10 = por %p2487_p5, %p2486_p0 }
 0x6e9   : > { %p2489_p13 = pnand %p2488_p10, %p2482_p8 }
 0x6eb   : > { %2492 = shalt.err (!%p2489_p13)
}
 0x6ec   : > { %s2493_s7 = scalar_lea.hbm %s3194_s0, 768  ;;  %s2497_s17 = scalar_lea.hbm %s3297_s4, 1536 }
 0x6ed   : > { %p2494_p9 = scmp.ne.s32.totalorder %s3194_s0, %s2493_s7  ;;  %p2498_p11 = scmp.lt.u32.totalorder %s3194_s0, %s3297_s4 }
 0x6ee   : > { %p2499_p12 = scmp.lt.u32.totalorder %s2497_s17, %s2493_s7  ;;  %p2501_p6 = scmp.lt.u32.totalorder %s2493_s7, %s3194_s0 }
 0x6ef   : > { %p2495_p3 = pnand %p2494_p9, %p2795_p2 }
 0x6f0   : > { %p2500_p1 = por %p2499_p12, %p2498_p11 }
 0x6f1   : > { %p2496_p7 = pneg %p2495_p3 }
 0x6f2   : > { %p2502_p8 = por %p2501_p6, %p2500_p1 }
 0x6f4   : > { %p2503_p0 = pnand %p2502_p8, %p2496_p7 }
 0x6f6   : > { %2506 = shalt.err (!%p2503_p0)
}
 0x6f7   : > { %s2611_s11 = smov 128   ;;  %s2612_s12 = smov 8  }
 0x6f8   : > { %2145 = dma.vmem_to_hbm [thread:$0]  (%p2795_p2), %s3196_s8, 768, %s3194_s0, %s1490_s27, %s2611_s11, %s2611_s11, %s2612_s12  }
 0x6f9   : > { %s2507_s1 = scalar_lea.vmem %s3199_s16, 128  ;;  %p2514_p9 = scmp.lt.s32.totalorder %s3199_s16, %s3199_s16 }
 0x6fa   : > { %p2508_p5 = scmp.ne.s32.totalorder %s3199_s16, %s2507_s1  ;;  %p2515_p3 = scmp.lt.s32.totalorder %s2507_s1, %s2507_s1 }
 0x6fc   : > { %p2509_p10 = pnand %p2508_p5, %p3328_p4  ;;  %p2516_p7 = por %p2515_p3, %p2514_p9 }
 0x6fe   : > { %p2510_p13 = pneg %p2509_p10 }
 0x700   : > { %p2517_p11 = pnand %p2516_p7, %p2510_p13 }
 0x702   : > { %2520 = shalt.err (!%p2517_p11)
}
 0x703   : > { %s2521_s9 = scalar_lea.hbm %s3299_s6, 128 }
 0x704   : > { %p2522_p2 = scmp.ne.s32.totalorder %s3299_s6, %s2521_s9  ;;  %p2527_p6 = scmp.lt.u32.totalorder %s2521_s9, %s3299_s6 }
 0x706   : > { %p2523_p12 = pnand %p2522_p2, %p3328_p4 }
 0x708   : > { %p2524_p1 = pneg %p2523_p12 }
 0x70a   : > { %p2529_p8 = pnand %p2527_p6, %p2524_p1 }
 0x70c   : > { %2532 = shalt.err (!%p2529_p8)
}
 0x70d   : > { %2149 = dma.vmem_to_hbm [thread:$0]  (%p3328_p4), %s3199_s16, 128, %s3299_s6, [#allocation14]  }
 0x70e   : > { %2570 = dma.done.wait (%p3328_p4), [#allocation14], 256  }
 0x70f   : > { %2572 = vsyncadd (%p3328_p4), [#allocation14], 4294967040 }
 0x710 PF: > { %s3329_s14 = sld [smem:[#allocation21_spill]]  ;;  %s1553_s28 = sand.u32 1, %s2579_s21  }
 0x711   : > { %p3331_p5 = scmp.ge.s32.totalorder %s2599_s26, 2  ;;  %s1554_s17 = scalar_lea.sflag [#allocation6], %s1553_s28 }
 0x716   : > { %p3330_p0 = scmp.ne.s32.totalorder %s3329_s14, 0 }
 0x718   : > { %p2170_p10 = pnand %p3331_p5, %p3330_p0 }
 0x71a   : > { %2574 = dma.done.wait (!%p2170_p10), %s1554_s17, 768  }
 0x71b   : > { %2576 = vsyncadd (!%p2170_p10), %s1554_s17, 4294966528  ;;  %s26_s26 = sadd.s32 1, %s2599_s26   ;;  %s3332_s21 = smov %s2583_s22 }
 0x71c   : > { %p23_p13 = scmp.ge.s32.totalorder %s26_s26, 4   ;;  %s3333_s22 = smov %s2587_s23 }
 0x71d   : > { %s3334_s23 = smov %s2811_s15  ;;  %s3335_s24 = smov %s2595_s25 }
 0x71e   : > { %s3336_s25 = smov %s3338_s19  ;;  %25 = sbr.rel (!%p23_p13) target bundleno = 12 (0xc), region = 128 }
 0x725   :  { %1559 = vsyncpa [#allocation5], 1 }
 0x726   :  { %1561 = vsyncpa [#allocation5 + $0x1], 1 }
 0x727   :  { %1562 = vsyncpa [#allocation8], 1 }
 0x728   :  { %1563 = vsyncpa [#allocation11], 1 }
 0x729   :  { %1565 = vsyncpa [#allocation11 + $0x1], 1 }
 0x72a   :  { %1566 = vsyncpa [#allocation6], 1 }
 0x72b   :  { %1568 = vsyncpa [#allocation6 + $0x1], 1 }
 0x72c   :  { %1569 = vsyncpa [#allocation14], 1 }

</bundles_post_ra>
